<compile_context>
chip_gen: v7x
topology: tpu7x:2x2x1
jax: 0.10.0
libtpu: 0.0.40
codegen_flags: <defaults>
</compile_context>

<pallas_src>
import jax
import jax.numpy as jnp
from jax.experimental import pallas as pl
from jax.experimental.pallas import tpu as pltpu


_BN_EPS = 1e-5


def _vmem_spec():
    return pl.BlockSpec(memory_space=pltpu.MemorySpace.VMEM)


# ------------------------------ fused kernel --------------------------------

def _fused_forward_kernel(x1_ref, w1_ref, sh1_ref, s1_ref,
                          w2_ref, sh2_ref, t2_ref, s2_ref,
                          w3_ref, sh3_ref, t3_ref, s3_ref,
                          w1r_ref, csel_ref, b1_ref, w2fc_ref, b2_ref,
                          o_ref):
    """Whole Conv1DCNN forward on VMEM-resident data.

    Activation layout: (C, B*L) -- channels on sublanes, batch*length on lanes.
    Every stride-2 gather (conv taps, maxpool) is a 0/1 selection matmul, so
    the body is only jnp.dot + elementwise ops (robust Mosaic lowering).
    """
    f32 = jnp.float32
    bf16 = jnp.bfloat16

    def mxu(a, b):
        # bf16 operands on the MXU, f32 accumulation (fast on v5e/v6e/v7x).
        return jnp.dot(a.astype(bf16), b.astype(bf16), preferred_element_type=f32)

    def conv_pool(h, w_r, sh_r, t_r, s_r):
        # Conv1d(k=3,s=2,p=1) = accumulation of 3 shifted matmuls (K = C_in),
        # BN shift + ReLU in f32, then MaxPool1d(2) = max of 2 selection matmuls.
        hb = h.astype(bf16)
        acc = mxu(w_r[0], mxu(hb, t_r[0]))
        acc = acc + mxu(w_r[1], mxu(hb, t_r[1]))
        acc = acc + mxu(w_r[2], mxu(hb, t_r[2]))
        y = jnp.maximum(acc + sh_r[...], 0.0)                    # f32 epilogue
        return jnp.maximum(mxu(y, s_r[0]), mxu(y, s_r[1]))       # fused maxpool

    # conv1: C_in == 1 -> three VPU broadcast multiply-adds (an MXU matmul with
    # K=3 would leave >95% of the contraction depth idle).
    x1 = x1_ref[...]                                             # (3, B*L/2) taps
    w1 = w1_ref[...]                                             # (16, 3) BN-folded
    y = w1[:, 0:1] * x1[0:1, :]
    y = y + w1[:, 1:2] * x1[1:2, :]
    y = y + w1[:, 2:3] * x1[2:3, :]
    y = jnp.maximum(y + sh1_ref[...], 0.0)                       # (16, B*L/2)
    h = jnp.maximum(mxu(y, s1_ref[0]), mxu(y, s1_ref[1]))        # pool1 (16, B*L/4)

    h = conv_pool(h, w2_ref, sh2_ref, t2_ref, s2_ref)            # (32, B*L/16)
    h = conv_pool(h, w3_ref, sh3_ref, t3_ref, s3_ref)            # (64, B*L/64)

    # FC head.  The torch channel-major flatten Flat[b, c*Lp+l] is folded into
    # the column-sliced W1 matrices (w1r_ref[l]) plus per-offset batch
    # selection matmuls -> no in-kernel reshape/transpose.
    hsum = mxu(mxu(w1r_ref[0], h), csel_ref[0])
    for l in range(1, w1r_ref.shape[0]):
        hsum = hsum + mxu(mxu(w1r_ref[l], h), csel_ref[l])
    hrelu = jnp.maximum(hsum + b1_ref[...], 0.0)                 # (256, B) f32
    # Dropout is identity in eval mode.
    o_ref[...] = mxu(w2fc_ref[...], hrelu) + b2_ref[...]         # (out, B)


# --------------------------- wrapper-side prep -------------------------------

def _fold_bn(w, b, gamma, beta, mean, var, eps=_BN_EPS):
    """Fold eval-mode BatchNorm1d into the conv weight and a per-channel shift."""
    s = gamma * jax.lax.rsqrt(var + eps)                         # (Co,)
    w_folded = w * s[:, None, None]                              # (Co, Ci, 3)
    shift = (b - mean) * s + beta                                # (Co,)
    return w_folded, shift


def _conv_tap_selectors(batch, l_in, dtype):
    """(3, B*l_in, B*l_in//2) 0/1 matrices: column (b*Lo+j) of tap t selects
    input position 2j+t-1 of batch b (zero column where that hits the pad)."""
    lo = l_in // 2
    k = jnp.arange(batch * l_in)[:, None]
    m = jnp.arange(batch * lo)[None, :]
    b_idx, j = m // lo, m % lo
    mats = []
    for t in range(3):
        pos = 2 * j + t - 1
        hit = (k == b_idx * l_in + pos) & (pos >= 0) & (pos < l_in)
        mats.append(hit.astype(dtype))
    return jnp.stack(mats, axis=0)


def _pool_selectors(batch, l_in, dtype):
    """(2, B*l_in, B*l_in//2) 0/1 matrices: column (b*Lp+q) of phase p selects
    position 2q+p of batch b; MaxPool1d(2) = elementwise max over the phases."""
    k = jnp.arange(batch * l_in)[:, None]
    m = jnp.arange(batch * (l_in // 2))[None, :]
    return jnp.stack([(k == 2 * m + p).astype(dtype) for p in range(2)], axis=0)


def _conv1_taps(x):
    """Pre-slice the raw (B, L) input into its 3 conv1 taps -> (3, B*L//2)."""
    b, l = x.shape
    lo = l // 2
    xp = jnp.pad(x, ((0, 0), (1, 1)))
    taps = [xp[:, t:t + 2 * lo - 1:2].reshape(b * lo) for t in range(3)]
    return jnp.stack(taps, axis=0)


def conv1dcnn_forward(params, x, shap_weights=None):
    """Mirrors Conv1DCNN.forward in eval mode (Dropout = identity)."""
    # TODO(synk): the shap_weights-is-not-None branch (SHAPAttention + fc1) is
    # not implemented; only the default shap_weights=None path is reproduced.
    assert shap_weights is None

    f32 = jnp.float32
    bf16 = jnp.bfloat16
    batch, length = x.shape
    assert length % 64 == 0, "module flatten assumes 64 * (input_size // 64)"

    # ---- BN folding + weight layout prep ----
    w1f, sh1 = _fold_bn(*params["conv1"])
    w2f, sh2 = _fold_bn(*params["conv2"])
    w3f, sh3 = _fold_bn(*params["conv3"])
    w1k = w1f[:, 0, :].astype(f32)                               # (16, 3) VPU path
    w2k = jnp.transpose(w2f, (2, 0, 1)).astype(bf16)             # (3, 32, 16)
    w3k = jnp.transpose(w3f, (2, 0, 1)).astype(bf16)             # (3, 64, 32)

    # ---- constant 0/1 selection matrices (constant-folded under jit) ----
    s1 = _pool_selectors(batch, length // 2, bf16)               # pool conv1 out
    t2 = _conv_tap_selectors(batch, length // 4, bf16)           # conv2 taps
    s2 = _pool_selectors(batch, length // 8, bf16)               # pool conv2 out
    t3 = _conv_tap_selectors(batch, length // 16, bf16)          # conv3 taps
    s3 = _pool_selectors(batch, length // 32, bf16)              # pool conv3 out

    # ---- FC head prep (channel-major flatten folded into W1 column slices) ----
    fc = params["fc"]
    lp = length // 64                                            # final spatial len
    out_dim = fc["w2"].shape[0]
    w1r = jnp.stack([fc["w1"][:, l::lp] for l in range(lp)], axis=0).astype(bf16)
    m = jnp.arange(batch * lp)[:, None]
    bcol = jnp.arange(batch)[None, :]
    csel = jnp.stack([(m == bcol * lp + l).astype(bf16) for l in range(lp)], axis=0)

    x1 = _conv1_taps(x)                                          # (3, B*L/2) f32

    # Single fused kernel; whole-array VMEM blocks, no grid (trivially fits at
    # this size on every TPU generation).  For large batch, tile the lane dim
    # with a ("parallel",) grid axis instead.
    out_t = pl.pallas_call(
        _fused_forward_kernel,
        out_shape=jax.ShapeDtypeStruct((out_dim, batch), f32),
        in_specs=[_vmem_spec()] * 17,
        out_specs=_vmem_spec(),
    )(x1, w1k, sh1.reshape(-1, 1), s1,
      w2k, sh2.reshape(-1, 1), t2, s2,
      w3k, sh3.reshape(-1, 1), t3, s3,
      w1r, csel, fc["b1"].reshape(-1, 1).astype(f32),
      fc["w2"].astype(bf16), fc["b2"].reshape(-1, 1).astype(f32))

    return out_t.T                                               # (B, out_dim)


# --------------------------- reference (plain JAX) ---------------------------

def _reference_forward(params, x, eps=_BN_EPS):
    """Straightforward XLA implementation mirroring the PyTorch module (eval)."""
    def block(h, w, b, gamma, beta, mean, var):
        lo = h.shape[2] // 2
        hp = jnp.pad(h, ((0, 0), (0, 0), (1, 1)))
        cols = jnp.stack([hp[:, :, t:t + 2 * lo - 1:2] for t in range(3)], axis=-1)
        y = jnp.einsum('bclt,oct->bol', cols, w) + b[None, :, None]
        s = gamma / jnp.sqrt(var + eps)
        y = y * s[None, :, None] + (beta - mean * s)[None, :, None]
        y = jnp.maximum(y, 0.0)
        return jnp.maximum(y[:, :, 0::2], y[:, :, 1::2])

    bsz = x.shape[0]
    h = x[:, None, :]
    for name in ("conv1", "conv2", "conv3"):
        h = block(h, *params[name])
    flat = h.reshape(bsz, -1)
    fc = params["fc"]
    hh = jnp.maximum(flat @ fc["w1"].T + fc["b1"], 0.0)
    return hh @ fc["w2"].T + fc["b2"]


# ------------------------------ parameter init -------------------------------

def init_params(key, input_size, output_size):
    flat = 64 * (input_size // 64)
    ks = jax.random.split(key, 8)

    def conv_p(k, ci, co):
        kw, kb = jax.random.split(k)
        w = 0.1 * jax.random.normal(kw, (co, ci, 3), jnp.float32)
        b = 0.1 * jax.random.normal(kb, (co,), jnp.float32)
        gamma = jnp.ones((co,), jnp.float32)      # BatchNorm1d eval-mode defaults
        beta = jnp.zeros((co,), jnp.float32)
        mean = jnp.zeros((co,), jnp.float32)
        var = jnp.ones((co,), jnp.float32)
        return (w, b, gamma, beta, mean, var)

    return {
        "conv1": conv_p(ks[0], 1, 16),
        "conv2": conv_p(ks[1], 16, 32),
        "conv3": conv_p(ks[2], 32, 64),
        "fc": {
            "w1": 0.05 * jax.random.normal(ks[3], (256, flat), jnp.float32),
            "b1": 0.05 * jax.random.normal(ks[4], (256,), jnp.float32),
            "w2": 0.05 * jax.random.normal(ks[5], (output_size, 256), jnp.float32),
            "b2": 0.05 * jax.random.normal(ks[6], (output_size,), jnp.float32),
        },
    }


# ----------------------------------- main ------------------------------------

if __name__ == "__main__":
    input_size, hidden_size, output_size = 256, 32, 8
    batch = 2

    key = jax.random.PRNGKey(0)
    kx, kp = jax.random.split(key)
    x = jax.random.normal(kx, (batch, input_size), jnp.float32)
    params = init_params(kp, input_size, output_size)

    fwd = jax.jit(conv1dcnn_forward)
    y = jax.block_until_ready(fwd(params, x))     # shap_weights=None path

    assert y.shape == (batch, output_size), y.shape
    assert bool(jnp.all(jnp.isfinite(y)))

    y_ref = _reference_forward(params, x)
    max_err = float(jnp.max(jnp.abs(y - y_ref)))
    assert bool(jnp.allclose(y, y_ref, rtol=5e-2, atol=5e-2)), max_err

    print("KERNEL_OK")
</pallas_src>

<mosaic_0001>
module attributes {stable_mosaic.version = 11 : i64} {
  func.func @_fused_forward_kernel(%arg0: memref<3x256xf32, #tpu.memory_space<vmem>>, %arg1: memref<16x3xf32, #tpu.memory_space<vmem>>, %arg2: memref<16x1xf32, #tpu.memory_space<vmem>>, %arg3: memref<2x256x128xbf16, #tpu.memory_space<vmem>>, %arg4: memref<3x32x16xbf16, #tpu.memory_space<vmem>>, %arg5: memref<32x1xf32, #tpu.memory_space<vmem>>, %arg6: memref<3x128x64xbf16, #tpu.memory_space<vmem>>, %arg7: memref<2x64x32xbf16, #tpu.memory_space<vmem>>, %arg8: memref<3x64x32xbf16, #tpu.memory_space<vmem>>, %arg9: memref<64x1xf32, #tpu.memory_space<vmem>>, %arg10: memref<3x32x16xbf16, #tpu.memory_space<vmem>>, %arg11: memref<2x16x8xbf16, #tpu.memory_space<vmem>>, %arg12: memref<4x256x64xbf16, #tpu.memory_space<vmem>>, %arg13: memref<4x8x2xbf16, #tpu.memory_space<vmem>>, %arg14: memref<256x1xf32, #tpu.memory_space<vmem>>, %arg15: memref<8x256xbf16, #tpu.memory_space<vmem>>, %arg16: memref<8x1xf32, #tpu.memory_space<vmem>>, %arg17: memref<8x2xf32, #tpu.memory_space<vmem>>) attributes {dimension_semantics = [], scalar_prefetch = 0 : i64, scratch_operands = 0 : i64, tpu.core_type = #tpu.core_type<tc>} {
    %c0 = arith.constant 0 : index
    %c0_0 = arith.constant 0 : index
    %0 = vector.load %arg0[%c0, %c0_0] : memref<3x256xf32, #tpu.memory_space<vmem>>, vector<3x256xf32>
    %c0_1 = arith.constant 0 : index
    %c0_2 = arith.constant 0 : index
    %1 = vector.load %arg1[%c0_1, %c0_2] : memref<16x3xf32, #tpu.memory_space<vmem>>, vector<16x3xf32>
    %2 = vector.extract_strided_slice %1 {offsets = [0, 0], sizes = [16, 1], strides = [1, 1]} : vector<16x3xf32> to vector<16x1xf32>
    %3 = vector.extract_strided_slice %0 {offsets = [0, 0], sizes = [1, 256], strides = [1, 1]} : vector<3x256xf32> to vector<1x256xf32>
    %4 = vector.broadcast %2 : vector<16x1xf32> to vector<16x256xf32>
    %5 = vector.broadcast %3 : vector<1x256xf32> to vector<16x256xf32>
    %6 = arith.mulf %4, %5 : vector<16x256xf32>
    %7 = vector.extract_strided_slice %1 {offsets = [0, 1], sizes = [16, 1], strides = [1, 1]} : vector<16x3xf32> to vector<16x1xf32>
    %8 = vector.extract_strided_slice %0 {offsets = [1, 0], sizes = [1, 256], strides = [1, 1]} : vector<3x256xf32> to vector<1x256xf32>
    %9 = vector.broadcast %7 : vector<16x1xf32> to vector<16x256xf32>
    %10 = vector.broadcast %8 : vector<1x256xf32> to vector<16x256xf32>
    %11 = arith.mulf %9, %10 : vector<16x256xf32>
    %12 = arith.addf %6, %11 : vector<16x256xf32>
    %13 = vector.extract_strided_slice %1 {offsets = [0, 2], sizes = [16, 1], strides = [1, 1]} : vector<16x3xf32> to vector<16x1xf32>
    %14 = vector.extract_strided_slice %0 {offsets = [2, 0], sizes = [1, 256], strides = [1, 1]} : vector<3x256xf32> to vector<1x256xf32>
    %15 = vector.broadcast %13 : vector<16x1xf32> to vector<16x256xf32>
    %16 = vector.broadcast %14 : vector<1x256xf32> to vector<16x256xf32>
    %17 = arith.mulf %15, %16 : vector<16x256xf32>
    %18 = arith.addf %12, %17 : vector<16x256xf32>
    %c0_3 = arith.constant 0 : index
    %c0_4 = arith.constant 0 : index
    %19 = vector.load %arg2[%c0_3, %c0_4] : memref<16x1xf32, #tpu.memory_space<vmem>>, vector<16x1xf32>
    %20 = vector.broadcast %19 : vector<16x1xf32> to vector<16x256xf32>
    %21 = arith.addf %18, %20 : vector<16x256xf32>
    %cst = arith.constant 0.000000e+00 : f32
    %22 = vector.broadcast %cst : f32 to vector<16x256xf32>
    %23 = arith.maximumf %21, %22 : vector<16x256xf32>
    %c0_5 = arith.constant 0 : index
    %c0_6 = arith.constant 0 : index
    %c0_7 = arith.constant 0 : index
    %24 = vector.load %arg3[%c0_5, %c0_6, %c0_7] : memref<2x256x128xbf16, #tpu.memory_space<vmem>>, vector<1x256x128xbf16>
    %25 = vector.shape_cast %24 : vector<1x256x128xbf16> to vector<256x128xbf16>
    %26 = arith.truncf %23 : vector<16x256xf32> to vector<16x256xbf16>
    %cst_8 = arith.constant dense<0.000000e+00> : vector<16x128xf32>
    %27 = tpu.matmul %26, %25, %cst_8 {dimension_numbers = #tpu.dot_dimension_numbers<[1], [0], [0], [1], [0, 0, 1, 1], [], []>} : vector<16x256xbf16>, vector<256x128xbf16>, vector<16x128xf32> -> vector<16x128xf32>
    %c1 = arith.constant 1 : index
    %c0_9 = arith.constant 0 : index
    %c0_10 = arith.constant 0 : index
    %28 = vector.load %arg3[%c1, %c0_9, %c0_10] : memref<2x256x128xbf16, #tpu.memory_space<vmem>>, vector<1x256x128xbf16>
    %29 = vector.shape_cast %28 : vector<1x256x128xbf16> to vector<256x128xbf16>
    %30 = arith.truncf %23 : vector<16x256xf32> to vector<16x256xbf16>
    %cst_11 = arith.constant dense<0.000000e+00> : vector<16x128xf32>
    %31 = tpu.matmul %30, %29, %cst_11 {dimension_numbers = #tpu.dot_dimension_numbers<[1], [0], [0], [1], [0, 0, 1, 1], [], []>} : vector<16x256xbf16>, vector<256x128xbf16>, vector<16x128xf32> -> vector<16x128xf32>
    %32 = arith.maximumf %27, %31 : vector<16x128xf32>
    %33 = arith.truncf %32 : vector<16x128xf32> to vector<16x128xbf16>
    %c0_12 = arith.constant 0 : index
    %c0_13 = arith.constant 0 : index
    %c0_14 = arith.constant 0 : index
    %34 = vector.load %arg4[%c0_12, %c0_13, %c0_14] : memref<3x32x16xbf16, #tpu.memory_space<vmem>>, vector<1x32x16xbf16>
    %35 = vector.shape_cast %34 : vector<1x32x16xbf16> to vector<32x16xbf16>
    %c0_15 = arith.constant 0 : index
    %c0_16 = arith.constant 0 : index
    %c0_17 = arith.constant 0 : index
    %36 = vector.load %arg6[%c0_15, %c0_16, %c0_17] : memref<3x128x64xbf16, #tpu.memory_space<vmem>>, vector<1x128x64xbf16>
    %37 = vector.shape_cast %36 : vector<1x128x64xbf16> to vector<128x64xbf16>
    %cst_18 = arith.constant dense<0.000000e+00> : vector<16x64xf32>
    %38 = tpu.matmul %33, %37, %cst_18 {dimension_numbers = #tpu.dot_dimension_numbers<[1], [0], [0], [1], [0, 0, 1, 1], [], []>} : vector<16x128xbf16>, vector<128x64xbf16>, vector<16x64xf32> -> vector<16x64xf32>
    %39 = arith.truncf %38 : vector<16x64xf32> to vector<16x64xbf16>
    %cst_19 = arith.constant dense<0.000000e+00> : vector<32x64xf32>
    %40 = tpu.matmul %35, %39, %cst_19 {dimension_numbers = #tpu.dot_dimension_numbers<[1], [0], [0], [1], [0, 0, 1, 1], [], []>} : vector<32x16xbf16>, vector<16x64xbf16>, vector<32x64xf32> -> vector<32x64xf32>
    %c1_20 = arith.constant 1 : index
    %c0_21 = arith.constant 0 : index
    %c0_22 = arith.constant 0 : index
    %41 = vector.load %arg4[%c1_20, %c0_21, %c0_22] : memref<3x32x16xbf16, #tpu.memory_space<vmem>>, vector<1x32x16xbf16>
    %42 = vector.shape_cast %41 : vector<1x32x16xbf16> to vector<32x16xbf16>
    %c1_23 = arith.constant 1 : index
    %c0_24 = arith.constant 0 : index
    %c0_25 = arith.constant 0 : index
    %43 = vector.load %arg6[%c1_23, %c0_24, %c0_25] : memref<3x128x64xbf16, #tpu.memory_space<vmem>>, vector<1x128x64xbf16>
    %44 = vector.shape_cast %43 : vector<1x128x64xbf16> to vector<128x64xbf16>
    %cst_26 = arith.constant dense<0.000000e+00> : vector<16x64xf32>
    %45 = tpu.matmul %33, %44, %cst_26 {dimension_numbers = #tpu.dot_dimension_numbers<[1], [0], [0], [1], [0, 0, 1, 1], [], []>} : vector<16x128xbf16>, vector<128x64xbf16>, vector<16x64xf32> -> vector<16x64xf32>
    %46 = arith.truncf %45 : vector<16x64xf32> to vector<16x64xbf16>
    %cst_27 = arith.constant dense<0.000000e+00> : vector<32x64xf32>
    %47 = tpu.matmul %42, %46, %cst_27 {dimension_numbers = #tpu.dot_dimension_numbers<[1], [0], [0], [1], [0, 0, 1, 1], [], []>} : vector<32x16xbf16>, vector<16x64xbf16>, vector<32x64xf32> -> vector<32x64xf32>
    %48 = arith.addf %40, %47 : vector<32x64xf32>
    %c2 = arith.constant 2 : index
    %c0_28 = arith.constant 0 : index
    %c0_29 = arith.constant 0 : index
    %49 = vector.load %arg4[%c2, %c0_28, %c0_29] : memref<3x32x16xbf16, #tpu.memory_space<vmem>>, vector<1x32x16xbf16>
    %50 = vector.shape_cast %49 : vector<1x32x16xbf16> to vector<32x16xbf16>
    %c2_30 = arith.constant 2 : index
    %c0_31 = arith.constant 0 : index
    %c0_32 = arith.constant 0 : index
    %51 = vector.load %arg6[%c2_30, %c0_31, %c0_32] : memref<3x128x64xbf16, #tpu.memory_space<vmem>>, vector<1x128x64xbf16>
    %52 = vector.shape_cast %51 : vector<1x128x64xbf16> to vector<128x64xbf16>
    %cst_33 = arith.constant dense<0.000000e+00> : vector<16x64xf32>
    %53 = tpu.matmul %33, %52, %cst_33 {dimension_numbers = #tpu.dot_dimension_numbers<[1], [0], [0], [1], [0, 0, 1, 1], [], []>} : vector<16x128xbf16>, vector<128x64xbf16>, vector<16x64xf32> -> vector<16x64xf32>
    %54 = arith.truncf %53 : vector<16x64xf32> to vector<16x64xbf16>
    %cst_34 = arith.constant dense<0.000000e+00> : vector<32x64xf32>
    %55 = tpu.matmul %50, %54, %cst_34 {dimension_numbers = #tpu.dot_dimension_numbers<[1], [0], [0], [1], [0, 0, 1, 1], [], []>} : vector<32x16xbf16>, vector<16x64xbf16>, vector<32x64xf32> -> vector<32x64xf32>
    %56 = arith.addf %48, %55 : vector<32x64xf32>
    %c0_35 = arith.constant 0 : index
    %c0_36 = arith.constant 0 : index
    %57 = vector.load %arg5[%c0_35, %c0_36] : memref<32x1xf32, #tpu.memory_space<vmem>>, vector<32x1xf32>
    %58 = vector.broadcast %57 : vector<32x1xf32> to vector<32x64xf32>
    %59 = arith.addf %56, %58 : vector<32x64xf32>
    %cst_37 = arith.constant 0.000000e+00 : f32
    %60 = vector.broadcast %cst_37 : f32 to vector<32x64xf32>
    %61 = arith.maximumf %59, %60 : vector<32x64xf32>
    %c0_38 = arith.constant 0 : index
    %c0_39 = arith.constant 0 : index
    %c0_40 = arith.constant 0 : index
    %62 = vector.load %arg7[%c0_38, %c0_39, %c0_40] : memref<2x64x32xbf16, #tpu.memory_space<vmem>>, vector<1x64x32xbf16>
    %63 = vector.shape_cast %62 : vector<1x64x32xbf16> to vector<64x32xbf16>
    %64 = arith.truncf %61 : vector<32x64xf32> to vector<32x64xbf16>
    %cst_41 = arith.constant dense<0.000000e+00> : vector<32x32xf32>
    %65 = tpu.matmul %64, %63, %cst_41 {dimension_numbers = #tpu.dot_dimension_numbers<[1], [0], [0], [1], [0, 0, 1, 1], [], []>} : vector<32x64xbf16>, vector<64x32xbf16>, vector<32x32xf32> -> vector<32x32xf32>
    %c1_42 = arith.constant 1 : index
    %c0_43 = arith.constant 0 : index
    %c0_44 = arith.constant 0 : index
    %66 = vector.load %arg7[%c1_42, %c0_43, %c0_44] : memref<2x64x32xbf16, #tpu.memory_space<vmem>>, vector<1x64x32xbf16>
    %67 = vector.shape_cast %66 : vector<1x64x32xbf16> to vector<64x32xbf16>
    %68 = arith.truncf %61 : vector<32x64xf32> to vector<32x64xbf16>
    %cst_45 = arith.constant dense<0.000000e+00> : vector<32x32xf32>
    %69 = tpu.matmul %68, %67, %cst_45 {dimension_numbers = #tpu.dot_dimension_numbers<[1], [0], [0], [1], [0, 0, 1, 1], [], []>} : vector<32x64xbf16>, vector<64x32xbf16>, vector<32x32xf32> -> vector<32x32xf32>
    %70 = arith.maximumf %65, %69 : vector<32x32xf32>
    %71 = arith.truncf %70 : vector<32x32xf32> to vector<32x32xbf16>
    %c0_46 = arith.constant 0 : index
    %c0_47 = arith.constant 0 : index
    %c0_48 = arith.constant 0 : index
    %72 = vector.load %arg8[%c0_46, %c0_47, %c0_48] : memref<3x64x32xbf16, #tpu.memory_space<vmem>>, vector<1x64x32xbf16>
    %73 = vector.shape_cast %72 : vector<1x64x32xbf16> to vector<64x32xbf16>
    %c0_49 = arith.constant 0 : index
    %c0_50 = arith.constant 0 : index
    %c0_51 = arith.constant 0 : index
    %74 = vector.load %arg10[%c0_49, %c0_50, %c0_51] : memref<3x32x16xbf16, #tpu.memory_space<vmem>>, vector<1x32x16xbf16>
    %75 = vector.shape_cast %74 : vector<1x32x16xbf16> to vector<32x16xbf16>
    %cst_52 = arith.constant dense<0.000000e+00> : vector<32x16xf32>
    %76 = tpu.matmul %71, %75, %cst_52 {dimension_numbers = #tpu.dot_dimension_numbers<[1], [0], [0], [1], [0, 0, 1, 1], [], []>} : vector<32x32xbf16>, vector<32x16xbf16>, vector<32x16xf32> -> vector<32x16xf32>
    %77 = arith.truncf %76 : vector<32x16xf32> to vector<32x16xbf16>
    %cst_53 = arith.constant dense<0.000000e+00> : vector<64x16xf32>
    %78 = tpu.matmul %73, %77, %cst_53 {dimension_numbers = #tpu.dot_dimension_numbers<[1], [0], [0], [1], [0, 0, 1, 1], [], []>} : vector<64x32xbf16>, vector<32x16xbf16>, vector<64x16xf32> -> vector<64x16xf32>
    %c1_54 = arith.constant 1 : index
    %c0_55 = arith.constant 0 : index
    %c0_56 = arith.constant 0 : index
    %79 = vector.load %arg8[%c1_54, %c0_55, %c0_56] : memref<3x64x32xbf16, #tpu.memory_space<vmem>>, vector<1x64x32xbf16>
    %80 = vector.shape_cast %79 : vector<1x64x32xbf16> to vector<64x32xbf16>
    %c1_57 = arith.constant 1 : index
    %c0_58 = arith.constant 0 : index
    %c0_59 = arith.constant 0 : index
    %81 = vector.load %arg10[%c1_57, %c0_58, %c0_59] : memref<3x32x16xbf16, #tpu.memory_space<vmem>>, vector<1x32x16xbf16>
    %82 = vector.shape_cast %81 : vector<1x32x16xbf16> to vector<32x16xbf16>
    %cst_60 = arith.constant dense<0.000000e+00> : vector<32x16xf32>
    %83 = tpu.matmul %71, %82, %cst_60 {dimension_numbers = #tpu.dot_dimension_numbers<[1], [0], [0], [1], [0, 0, 1, 1], [], []>} : vector<32x32xbf16>, vector<32x16xbf16>, vector<32x16xf32> -> vector<32x16xf32>
    %84 = arith.truncf %83 : vector<32x16xf32> to vector<32x16xbf16>
    %cst_61 = arith.constant dense<0.000000e+00> : vector<64x16xf32>
    %85 = tpu.matmul %80, %84, %cst_61 {dimension_numbers = #tpu.dot_dimension_numbers<[1], [0], [0], [1], [0, 0, 1, 1], [], []>} : vector<64x32xbf16>, vector<32x16xbf16>, vector<64x16xf32> -> vector<64x16xf32>
    %86 = arith.addf %78, %85 : vector<64x16xf32>
    %c2_62 = arith.constant 2 : index
    %c0_63 = arith.constant 0 : index
    %c0_64 = arith.constant 0 : index
    %87 = vector.load %arg8[%c2_62, %c0_63, %c0_64] : memref<3x64x32xbf16, #tpu.memory_space<vmem>>, vector<1x64x32xbf16>
    %88 = vector.shape_cast %87 : vector<1x64x32xbf16> to vector<64x32xbf16>
    %c2_65 = arith.constant 2 : index
    %c0_66 = arith.constant 0 : index
    %c0_67 = arith.constant 0 : index
    %89 = vector.load %arg10[%c2_65, %c0_66, %c0_67] : memref<3x32x16xbf16, #tpu.memory_space<vmem>>, vector<1x32x16xbf16>
    %90 = vector.shape_cast %89 : vector<1x32x16xbf16> to vector<32x16xbf16>
    %cst_68 = arith.constant dense<0.000000e+00> : vector<32x16xf32>
    %91 = tpu.matmul %71, %90, %cst_68 {dimension_numbers = #tpu.dot_dimension_numbers<[1], [0], [0], [1], [0, 0, 1, 1], [], []>} : vector<32x32xbf16>, vector<32x16xbf16>, vector<32x16xf32> -> vector<32x16xf32>
    %92 = arith.truncf %91 : vector<32x16xf32> to vector<32x16xbf16>
    %cst_69 = arith.constant dense<0.000000e+00> : vector<64x16xf32>
    %93 = tpu.matmul %88, %92, %cst_69 {dimension_numbers = #tpu.dot_dimension_numbers<[1], [0], [0], [1], [0, 0, 1, 1], [], []>} : vector<64x32xbf16>, vector<32x16xbf16>, vector<64x16xf32> -> vector<64x16xf32>
    %94 = arith.addf %86, %93 : vector<64x16xf32>
    %c0_70 = arith.constant 0 : index
    %c0_71 = arith.constant 0 : index
    %95 = vector.load %arg9[%c0_70, %c0_71] : memref<64x1xf32, #tpu.memory_space<vmem>>, vector<64x1xf32>
    %96 = vector.broadcast %95 : vector<64x1xf32> to vector<64x16xf32>
    %97 = arith.addf %94, %96 : vector<64x16xf32>
    %cst_72 = arith.constant 0.000000e+00 : f32
    %98 = vector.broadcast %cst_72 : f32 to vector<64x16xf32>
    %99 = arith.maximumf %97, %98 : vector<64x16xf32>
    %c0_73 = arith.constant 0 : index
    %c0_74 = arith.constant 0 : index
    %c0_75 = arith.constant 0 : index
    %100 = vector.load %arg11[%c0_73, %c0_74, %c0_75] : memref<2x16x8xbf16, #tpu.memory_space<vmem>>, vector<1x16x8xbf16>
    %101 = vector.shape_cast %100 : vector<1x16x8xbf16> to vector<16x8xbf16>
    %102 = arith.truncf %99 : vector<64x16xf32> to vector<64x16xbf16>
    %cst_76 = arith.constant dense<0.000000e+00> : vector<64x8xf32>
    %103 = tpu.matmul %102, %101, %cst_76 {dimension_numbers = #tpu.dot_dimension_numbers<[1], [0], [0], [1], [0, 0, 1, 1], [], []>} : vector<64x16xbf16>, vector<16x8xbf16>, vector<64x8xf32> -> vector<64x8xf32>
    %c1_77 = arith.constant 1 : index
    %c0_78 = arith.constant 0 : index
    %c0_79 = arith.constant 0 : index
    %104 = vector.load %arg11[%c1_77, %c0_78, %c0_79] : memref<2x16x8xbf16, #tpu.memory_space<vmem>>, vector<1x16x8xbf16>
    %105 = vector.shape_cast %104 : vector<1x16x8xbf16> to vector<16x8xbf16>
    %106 = arith.truncf %99 : vector<64x16xf32> to vector<64x16xbf16>
    %cst_80 = arith.constant dense<0.000000e+00> : vector<64x8xf32>
    %107 = tpu.matmul %106, %105, %cst_80 {dimension_numbers = #tpu.dot_dimension_numbers<[1], [0], [0], [1], [0, 0, 1, 1], [], []>} : vector<64x16xbf16>, vector<16x8xbf16>, vector<64x8xf32> -> vector<64x8xf32>
    %108 = arith.maximumf %103, %107 : vector<64x8xf32>
    %c0_81 = arith.constant 0 : index
    %c0_82 = arith.constant 0 : index
    %c0_83 = arith.constant 0 : index
    %109 = vector.load %arg12[%c0_81, %c0_82, %c0_83] : memref<4x256x64xbf16, #tpu.memory_space<vmem>>, vector<1x256x64xbf16>
    %110 = vector.shape_cast %109 : vector<1x256x64xbf16> to vector<256x64xbf16>
    %111 = arith.truncf %108 : vector<64x8xf32> to vector<64x8xbf16>
    %cst_84 = arith.constant dense<0.000000e+00> : vector<256x8xf32>
    %112 = tpu.matmul %110, %111, %cst_84 {dimension_numbers = #tpu.dot_dimension_numbers<[1], [0], [0], [1], [0, 0, 1, 1], [], []>} : vector<256x64xbf16>, vector<64x8xbf16>, vector<256x8xf32> -> vector<256x8xf32>
    %c0_85 = arith.constant 0 : index
    %c0_86 = arith.constant 0 : index
    %c0_87 = arith.constant 0 : index
    %113 = vector.load %arg13[%c0_85, %c0_86, %c0_87] : memref<4x8x2xbf16, #tpu.memory_space<vmem>>, vector<1x8x2xbf16>
    %114 = vector.shape_cast %113 : vector<1x8x2xbf16> to vector<8x2xbf16>
    %115 = arith.truncf %112 : vector<256x8xf32> to vector<256x8xbf16>
    %cst_88 = arith.constant dense<0.000000e+00> : vector<256x2xf32>
    %116 = tpu.matmul %115, %114, %cst_88 {dimension_numbers = #tpu.dot_dimension_numbers<[1], [0], [0], [1], [0, 0, 1, 1], [], []>} : vector<256x8xbf16>, vector<8x2xbf16>, vector<256x2xf32> -> vector<256x2xf32>
    %c1_89 = arith.constant 1 : index
    %c0_90 = arith.constant 0 : index
    %c0_91 = arith.constant 0 : index
    %117 = vector.load %arg12[%c1_89, %c0_90, %c0_91] : memref<4x256x64xbf16, #tpu.memory_space<vmem>>, vector<1x256x64xbf16>
    %118 = vector.shape_cast %117 : vector<1x256x64xbf16> to vector<256x64xbf16>
    %119 = arith.truncf %108 : vector<64x8xf32> to vector<64x8xbf16>
    %cst_92 = arith.constant dense<0.000000e+00> : vector<256x8xf32>
    %120 = tpu.matmul %118, %119, %cst_92 {dimension_numbers = #tpu.dot_dimension_numbers<[1], [0], [0], [1], [0, 0, 1, 1], [], []>} : vector<256x64xbf16>, vector<64x8xbf16>, vector<256x8xf32> -> vector<256x8xf32>
    %c1_93 = arith.constant 1 : index
    %c0_94 = arith.constant 0 : index
    %c0_95 = arith.constant 0 : index
    %121 = vector.load %arg13[%c1_93, %c0_94, %c0_95] : memref<4x8x2xbf16, #tpu.memory_space<vmem>>, vector<1x8x2xbf16>
    %122 = vector.shape_cast %121 : vector<1x8x2xbf16> to vector<8x2xbf16>
    %123 = arith.truncf %120 : vector<256x8xf32> to vector<256x8xbf16>
    %cst_96 = arith.constant dense<0.000000e+00> : vector<256x2xf32>
    %124 = tpu.matmul %123, %122, %cst_96 {dimension_numbers = #tpu.dot_dimension_numbers<[1], [0], [0], [1], [0, 0, 1, 1], [], []>} : vector<256x8xbf16>, vector<8x2xbf16>, vector<256x2xf32> -> vector<256x2xf32>
    %125 = arith.addf %116, %124 : vector<256x2xf32>
    %c2_97 = arith.constant 2 : index
    %c0_98 = arith.constant 0 : index
    %c0_99 = arith.constant 0 : index
    %126 = vector.load %arg12[%c2_97, %c0_98, %c0_99] : memref<4x256x64xbf16, #tpu.memory_space<vmem>>, vector<1x256x64xbf16>
    %127 = vector.shape_cast %126 : vector<1x256x64xbf16> to vector<256x64xbf16>
    %128 = arith.truncf %108 : vector<64x8xf32> to vector<64x8xbf16>
    %cst_100 = arith.constant dense<0.000000e+00> : vector<256x8xf32>
    %129 = tpu.matmul %127, %128, %cst_100 {dimension_numbers = #tpu.dot_dimension_numbers<[1], [0], [0], [1], [0, 0, 1, 1], [], []>} : vector<256x64xbf16>, vector<64x8xbf16>, vector<256x8xf32> -> vector<256x8xf32>
    %c2_101 = arith.constant 2 : index
    %c0_102 = arith.constant 0 : index
    %c0_103 = arith.constant 0 : index
    %130 = vector.load %arg13[%c2_101, %c0_102, %c0_103] : memref<4x8x2xbf16, #tpu.memory_space<vmem>>, vector<1x8x2xbf16>
    %131 = vector.shape_cast %130 : vector<1x8x2xbf16> to vector<8x2xbf16>
    %132 = arith.truncf %129 : vector<256x8xf32> to vector<256x8xbf16>
    %cst_104 = arith.constant dense<0.000000e+00> : vector<256x2xf32>
    %133 = tpu.matmul %132, %131, %cst_104 {dimension_numbers = #tpu.dot_dimension_numbers<[1], [0], [0], [1], [0, 0, 1, 1], [], []>} : vector<256x8xbf16>, vector<8x2xbf16>, vector<256x2xf32> -> vector<256x2xf32>
    %134 = arith.addf %125, %133 : vector<256x2xf32>
    %c3 = arith.constant 3 : index
    %c0_105 = arith.constant 0 : index
    %c0_106 = arith.constant 0 : index
    %135 = vector.load %arg12[%c3, %c0_105, %c0_106] : memref<4x256x64xbf16, #tpu.memory_space<vmem>>, vector<1x256x64xbf16>
    %136 = vector.shape_cast %135 : vector<1x256x64xbf16> to vector<256x64xbf16>
    %137 = arith.truncf %108 : vector<64x8xf32> to vector<64x8xbf16>
    %cst_107 = arith.constant dense<0.000000e+00> : vector<256x8xf32>
    %138 = tpu.matmul %136, %137, %cst_107 {dimension_numbers = #tpu.dot_dimension_numbers<[1], [0], [0], [1], [0, 0, 1, 1], [], []>} : vector<256x64xbf16>, vector<64x8xbf16>, vector<256x8xf32> -> vector<256x8xf32>
    %c3_108 = arith.constant 3 : index
    %c0_109 = arith.constant 0 : index
    %c0_110 = arith.constant 0 : index
    %139 = vector.load %arg13[%c3_108, %c0_109, %c0_110] : memref<4x8x2xbf16, #tpu.memory_space<vmem>>, vector<1x8x2xbf16>
    %140 = vector.shape_cast %139 : vector<1x8x2xbf16> to vector<8x2xbf16>
    %141 = arith.truncf %138 : vector<256x8xf32> to vector<256x8xbf16>
    %cst_111 = arith.constant dense<0.000000e+00> : vector<256x2xf32>
    %142 = tpu.matmul %141, %140, %cst_111 {dimension_numbers = #tpu.dot_dimension_numbers<[1], [0], [0], [1], [0, 0, 1, 1], [], []>} : vector<256x8xbf16>, vector<8x2xbf16>, vector<256x2xf32> -> vector<256x2xf32>
    %143 = arith.addf %134, %142 : vector<256x2xf32>
    %c0_112 = arith.constant 0 : index
    %c0_113 = arith.constant 0 : index
    %144 = vector.load %arg14[%c0_112, %c0_113] : memref<256x1xf32, #tpu.memory_space<vmem>>, vector<256x1xf32>
    %145 = vector.broadcast %144 : vector<256x1xf32> to vector<256x2xf32>
    %146 = arith.addf %143, %145 : vector<256x2xf32>
    %cst_114 = arith.constant 0.000000e+00 : f32
    %147 = vector.broadcast %cst_114 : f32 to vector<256x2xf32>
    %148 = arith.maximumf %146, %147 : vector<256x2xf32>
    %c0_115 = arith.constant 0 : index
    %c0_116 = arith.constant 0 : index
    %149 = vector.load %arg15[%c0_115, %c0_116] : memref<8x256xbf16, #tpu.memory_space<vmem>>, vector<8x256xbf16>
    %150 = arith.truncf %148 : vector<256x2xf32> to vector<256x2xbf16>
    %cst_117 = arith.constant dense<0.000000e+00> : vector<8x2xf32>
    %151 = tpu.matmul %149, %150, %cst_117 {dimension_numbers = #tpu.dot_dimension_numbers<[1], [0], [0], [1], [0, 0, 1, 1], [], []>} : vector<8x256xbf16>, vector<256x2xbf16>, vector<8x2xf32> -> vector<8x2xf32>
    %c0_118 = arith.constant 0 : index
    %c0_119 = arith.constant 0 : index
    %152 = vector.load %arg16[%c0_118, %c0_119] : memref<8x1xf32, #tpu.memory_space<vmem>>, vector<8x1xf32>
    %153 = vector.broadcast %152 : vector<8x1xf32> to vector<8x2xf32>
    %154 = arith.addf %151, %153 : vector<8x2xf32>
    %c0_120 = arith.constant 0 : index
    %c0_121 = arith.constant 0 : index
    %155 = vector.load %arg17[%c0_120, %c0_121] : memref<8x2xf32, #tpu.memory_space<vmem>>, vector<8x2xf32>
    tpu.vector_store %arg17[%c0_120, %c0_121], %154 {strides = array<i32>} : memref<8x2xf32, #tpu.memory_space<vmem>>, vector<8x2xf32>,
    return
  }
}

</mosaic_0001>

<bundles_post_ra>
// kernel: conv1dcnn_forward.1
= control target key start
LH: loop header
LB: loop body
LE: loop exit
PB: predicated region body
PF: predicated region fallthrough
CT: control target
= control target key end

     0   :  { %v6243_v0 = vmov 1   ;;  %v6244_v1 = vmov 0   ;;  %v6245_v4 = vmov 2   ;;  %vm6247_vm0 = vmmov 0   ;;  %s7555_s1 = inlined_call_operand.vmem [shape: f32[16,3], index: 1, kind: input, shape index: {}]   ;;  %s7556_s2 = inlined_call_operand.vmem [shape: f32[16,1], index: 2, kind: input, shape index: {}]   ;;  %s7557_s5 = inlined_call_operand.vmem [shape: f32[32,1], index: 5, kind: input, shape index: {}]   ;;  %s7558_s3 = inlined_call_operand.vmem [shape: bf16[2,256,128], index: 3, kind: input, shape index: {}]   ;;  %s7559_s9 = inlined_call_operand.vmem [shape: f32[64,1], index: 9, kind: input, shape index: {}]   ;;  %s7560_s14 = inlined_call_operand.vmem [shape: f32[256,1], index: 14, kind: input, shape index: {}]   ;;  %s7561_s16 = inlined_call_operand.vmem [shape: f32[8,1], index: 16, kind: input, shape index: {}]   ;;  %s7562_s6 = inlined_call_operand.vmem [shape: bf16[3,128,64], index: 6, kind: input, shape index: {}]   ;;  %s7563_s0 = inlined_call_operand.vmem [shape: f32[3,256], index: 0, kind: input, shape index: {}]   ;;  %s7564_s4 = inlined_call_operand.vmem [shape: bf16[3,32,16], index: 4, kind: input, shape index: {}]   ;;  %s7565_s7 = inlined_call_operand.vmem [shape: bf16[2,64,32], index: 7, kind: input, shape index: {}]   ;;  %s7566_s10 = inlined_call_operand.vmem [shape: bf16[3,32,16], index: 10, kind: input, shape index: {}]   ;;  %s7567_s8 = inlined_call_operand.vmem [shape: bf16[3,64,32], index: 8, kind: input, shape index: {}]   ;;  %s7568_s11 = inlined_call_operand.vmem [shape: bf16[2,16,8], index: 11, kind: input, shape index: {}]   ;;  %s7569_s12 = inlined_call_operand.vmem [shape: bf16[4,256,64], index: 12, kind: input, shape index: {}]   ;;  %s7570_s13 = inlined_call_operand.vmem [shape: bf16[4,8,2], index: 13, kind: input, shape index: {}]   ;;  %s7571_s15 = inlined_call_operand.vmem [shape: bf16[8,256], index: 15, kind: input, shape index: {}]   ;;  %s7572_s17 = inlined_call_operand.vmem [shape: f32[8,2], index: 17, kind: output, shape index: {}]  }
   0x1   :  { %7575 = sst [smem:[#allocation2_spill]] %s7555_s1  ;;  %6082 = vset.pattern.permute.xlu1 %v6243_v0  ;;  %6081 = vset.pattern.permute.xlu0 %v6244_v1  ;;  %v1059_v7 = vld [vmem:[%s7557_s5] sm:$0xff]  ;;  %v1061_v8 = vld [vmem:[%s7557_s5 + $0x10] sm:$0xff]  ;;  %v1060_v10 = vld [vmem:[%s7557_s5 + $0x8] sm:$0xff]  ;;  %vm757_vm1 = vcmask 130048   ;;  %vm1125_vm2 = vcmask 523264  }
   0x2   :  { %7576 = sst [smem:[#allocation3_spill]] %s7556_s2  ;;  %s7577_s26 = sld [smem:[#allocation2_spill]]  ;;  %v6087_v9 = vld [vmem:[%s7558_s3 + $0x40] sm:$0xff]   ;;  %v6091_v15 = vld [vmem:[%s7558_s3 + $0x48] sm:$0xff]   ;;  %v1062_v16 = vld [vmem:[%s7557_s5 + $0x18] sm:$0xff]  ;;  %vm1293_vm3 = vcmask 261120  }
   0x3   :  { %s7578_s30 = sld [smem:[#allocation3_spill]]  ;;  %v1804_v11 = vld [vmem:[%s7559_s9] sm:$0xff]  ;;  %5172 = vmatprep.subr.bf16.mxu0 %v6087_v9  ;;  %v1806_v17 = vld [vmem:[%s7559_s9 + $0x10] sm:$0xff]  ;;  %v6092_v18 = vld [vmem:[%s7558_s3 + $0xc8] sm:$0xff]   ;;  %vm2770_vm4 = vcmask 1043456   ;;  %vm2721_vm5 = vcmask 64512  }
   0x4   :  { %v6088_v12 = vld [vmem:[%s7558_s3 + $0xc0] sm:$0xff]   ;;  %v6093_v19 = vld [vmem:[%s7558_s3 + $0x8] sm:$0xff]   ;;  %v6095_v21 = vld [vmem:[%s7558_s3 + $0x50] sm:$0xff]   ;;  %vm4641_vm6 = vcmask 15360  }
   0x5   :  { %v6089_v13 = vld [vmem:[%s7558_s3] sm:$0xff]   ;;  %5194 = vmatprep.subr.bf16.mxu1 %v6088_v12  ;;  %v6094_v20 = vld [vmem:[%s7558_s3 + $0x88] sm:$0xff]   ;;  %v6096_v23 = vld [vmem:[%s7558_s3 + $0xd0] sm:$0xff]  }
   0x6   :  { %v6090_v14 = vld [vmem:[%s7558_s3 + $0x80] sm:$0xff]   ;;  %5173 = vmatpush3.bf16.msra.mxu0 %v6089_v13  ;;  %v1805_v22 = vld [vmem:[%s7559_s9 + $0x8] sm:$0xff]  ;;  %v6097_v24 = vld [vmem:[%s7558_s3 + $0x10] sm:$0xff]  }
   0x7   :  { %5195 = vmatpush3.bf16.msra.mxu1 %v6090_v14  ;;  %5174 = vmatprep.subr.bf16.mxu0 %v6091_v15  ;;  %v1808_v25 = vld [vmem:[%s7559_s9 + $0x20] sm:$0xff]  ;;  %v6098_v26 = vld [vmem:[%s7558_s3 + $0x90] sm:$0xff]   ;;  %v6099_v27 = vld [vmem:[%s7558_s3 + $0x58] sm:$0xff]  }
   0x8   :  { %v58_v2 = vld [vmem:[%s7577_s26] sm:$0xff]  ;;  %v59_v3 = vld [vmem:[%s7577_s26 + $0x8] sm:$0xff]  ;;  %5196 = vmatprep.subr.bf16.mxu1 %v6092_v18  ;;  %v1807_v28 = vld [vmem:[%s7559_s9 + $0x18] sm:$0xff] }
   0x9   :  { %94 = vperm.xlu1 %6082, %v58_v2   ;;  %62 = vperm.xlu0 %6081, %v58_v2   ;;  %v161_v5 = vld [vmem:[%s7578_s30] sm:$0xff]  ;;  %v162_v6 = vld [vmem:[%s7578_s30 + $0x8] sm:$0xff]  ;;  %v1810_v29 = vld [vmem:[%s7559_s9 + $0x30] sm:$0xff] }
   0xa   :  { %5175 = vmatpush3.bf16.msra.mxu0 %v6093_v19  ;;  %v6100_v30 = vld [vmem:[%s7558_s3 + $0xd8] sm:$0xff]   ;;  %v6103_v33 = vld [vmem:[%s7558_s3 + $0x60] sm:$0xff]   ;;  %v1809_v34 = vld [vmem:[%s7559_s9 + $0x28] sm:$0xff] }
   0xb   :  { %5197 = vmatpush3.bf16.msra.mxu1 %v6094_v20  ;;  %5176 = vmatprep.subr.bf16.mxu0 %v6095_v21  ;;  %v6101_v31 = vld [vmem:[%s7558_s3 + $0x18] sm:$0xff]   ;;  %v4331_v35 = vld [vmem:[%s7560_s14 + $0x80] sm:$0xff]  ;;  %v6107_v39 = vld [vmem:[%s7558_s3 + $0x68] sm:$0xff]   ;;  %v6246_v20 = vmov 0.0   ;;  %v71_v21 = vlaneseq }
   0xc   :  { %5198 = vmatprep.subr.bf16.mxu1 %v6096_v23  ;;  %v6102_v32 = vld [vmem:[%s7558_s3 + $0x98] sm:$0xff]   ;;  %v6104_v36 = vld [vmem:[%s7558_s3 + $0xe0] sm:$0xff]   ;;  %v6108_v42 = vld [vmem:[%s7558_s3 + $0xe8] sm:$0xff]  }
   0xd   :  { %98 = vperm.xlu1 %6082, %v59_v3   ;;  %67 = vperm.xlu0 %6081, %v59_v3   ;;  %v6105_v37 = vld [vmem:[%s7558_s3 + $0x20] sm:$0xff]   ;;  %v1811_v40 = vld [vmem:[%s7559_s9 + $0x38] sm:$0xff]  ;;  %v6109_v43 = vld [vmem:[%s7558_s3 + $0x28] sm:$0xff]  }
   0xe   :  { %5177 = vmatpush3.bf16.msra.mxu0 %v6097_v24  ;;  %v6106_v38 = vld [vmem:[%s7558_s3 + $0xa0] sm:$0xff]   ;;  %v6110_v44 = vld [vmem:[%s7558_s3 + $0xa8] sm:$0xff]   ;;  %v6111_v45 = vld [vmem:[%s7558_s3 + $0x70] sm:$0xff]  }
   0xf   :  { %5199 = vmatpush3.bf16.msra.mxu1 %v6098_v26  ;;  %5178 = vmatprep.subr.bf16.mxu0 %v6099_v27  ;;  %v4315_v41 = vld [vmem:[%s7560_s14] sm:$0xff]  ;;  %v4332_v46 = vld [vmem:[%s7560_s14 + $0x88] sm:$0xff]  ;;  %v4333_v47 = vld [vmem:[%s7560_s14 + $0x90] sm:$0xff] }
  0x10   :  { %5200 = vmatprep.subr.bf16.mxu1 %v6100_v30  ;;  %v6112_v48 = vld [vmem:[%s7558_s3 + $0xf0] sm:$0xff]   ;;  %v6115_v51 = vld [vmem:[%s7558_s3 + $0x78] sm:$0xff]   ;;  %v4316_v52 = vld [vmem:[%s7560_s14 + $0x8] sm:$0xff] }
  0x11   :  { %6084 = vset.pattern.permute.xlu1 %v6245_v4  ;;  %6083 = vset.pattern.permute.xlu0 %v6245_v4  ;;  %v6113_v49 = vld [vmem:[%s7558_s3 + $0x30] sm:$0xff]   ;;  %v6116_v53 = vld [vmem:[%s7558_s3 + $0xf8] sm:$0xff]   ;;  %v4335_v58 = vld [vmem:[%s7560_s14 + $0xa0] sm:$0xff] }
  0x12   :  { %132 = vperm.xlu1 %6084, %v59_v3   ;;  %128 = vperm.xlu0 %6083, %v58_v2   ;;  %v6114_v50 = vld [vmem:[%s7558_s3 + $0xb0] sm:$0xff]   ;;  %v6117_v54 = vld [vmem:[%s7558_s3 + $0x38] sm:$0xff]   ;;  %v4319_v60 = vld [vmem:[%s7560_s14 + $0x20] sm:$0xff] }
  0x13   :  { %5179 = vmatpush3.bf16.msra.mxu0 %v6101_v31  ;;  %5201 = vmatpush3.bf16.msra.mxu1 %v6102_v32  ;;  %v4317_v55 = vld [vmem:[%s7560_s14 + $0x10] sm:$0xff]  ;;  %v6118_v56 = vld [vmem:[%s7558_s3 + $0xb8] sm:$0xff]   ;;  %v4336_v61 = vld [vmem:[%s7560_s14 + $0xa8] sm:$0xff] }
  0x14   :  { %5180 = vmatprep.subr.bf16.mxu0 %v6103_v33  ;;  %5202 = vmatprep.subr.bf16.mxu1 %v6104_v36  ;;  %v4334_v57 = vld [vmem:[%s7560_s14 + $0x98] sm:$0xff]  ;;  %v4337_v62 = vld [vmem:[%s7560_s14 + $0xb0] sm:$0xff]  ;;  %v4320_v63 = vld [vmem:[%s7560_s14 + $0x28] sm:$0xff] }
  0x15   :  { %v4318_v59 = vld [vmem:[%s7560_s14 + $0x18] sm:$0xff]  ;;  %v4321_v0 = vld [vmem:[%s7560_s14 + $0x30] sm:$0xff]  ;;  %v4339_v2 = vld [vmem:[%s7560_s14 + $0xc0] sm:$0xff] }
  0x16   :  { %6085 = vset.pattern.permute.xlu1 %v6244_v1  ;;  %6086 = vset.pattern.permute.xlu0 %v6244_v1  ;;  %v4338_v1 = vld [vmem:[%s7560_s14 + $0xb8] sm:$0xff]  ;;  %v4323_v4 = vld [vmem:[%s7560_s14 + $0x40] sm:$0xff]  ;;  %v4344_v13 = vld [vmem:[%s7560_s14 + $0xe8] sm:$0xff] }
  0x17   :  { %165 = vperm.xlu1 %6085, %v161_v5   ;;  %170 = vperm.xlu0 %6086, %v162_v6   ;;  %v4322_v3 = vld [vmem:[%s7560_s14 + $0x38] sm:$0xff]  ;;  %v4340_v5 = vld [vmem:[%s7560_s14 + $0xc8] sm:$0xff]  ;;  %v4341_v6 = vld [vmem:[%s7560_s14 + $0xd0] sm:$0xff] }
  0x18   :  { %5181 = vmatpush3.bf16.msra.mxu0 %v6105_v37  ;;  %5203 = vmatpush3.bf16.msra.mxu1 %v6106_v38  ;;  %v4342_v9 = vld [vmem:[%s7560_s14 + $0xd8] sm:$0xff]  ;;  %v4327_v12 = vld [vmem:[%s7560_s14 + $0x60] sm:$0xff]  ;;  %v4345_v14 = vld [vmem:[%s7560_s14 + $0xf0] sm:$0xff] }
  0x19   :  { %5182 = vmatprep.subr.bf16.mxu0 %v6107_v39  ;;  %5204 = vmatprep.subr.bf16.mxu1 %v6108_v42  ;;  %v4328_v15 = vld [vmem:[%s7560_s14 + $0x68] sm:$0xff]  ;;  %v4588_v18 = vld [vmem:[%s7561_s16] sm:$0xff]  ;;  %v4330_v19 = vld [vmem:[%s7560_s14 + $0x78] sm:$0xff] }
  0x1b   :  { %1065 = vperm.xlu1 %6085, %v1059_v7   ;;  %1075 = vperm.xlu0 %6086, %v1061_v8   ;;  %v4324_v7 = vld [vmem:[%s7560_s14 + $0x48] sm:$0xff]  ;;  %v4325_v8 = vld [vmem:[%s7560_s14 + $0x50] sm:$0xff] }
  0x1c   :  { %5183 = vmatpush3.bf16.msra.mxu0 %v6109_v43  ;;  %5205 = vmatpush3.bf16.msra.mxu1 %v6110_v44 }
  0x1d   :  { %5184 = vmatprep.subr.bf16.mxu0 %v6111_v45  ;;  %5206 = vmatprep.subr.bf16.mxu1 %v6112_v48 }
  0x1f   :  { %1070 = vperm.xlu1 %6085, %v1060_v10   ;;  %1814 = vperm.xlu0 %6086, %v1804_v11   ;;  %v4343_v10 = vld [vmem:[%s7560_s14 + $0xe0] sm:$0xff]  ;;  %v4326_v11 = vld [vmem:[%s7560_s14 + $0x58] sm:$0xff] }
  0x20   :  { %5185 = vmatpush3.bf16.msra.mxu0 %v6113_v49  ;;  %5207 = vmatpush3.bf16.msra.mxu1 %v6114_v50 }
  0x21   :  { %5186 = vmatprep.subr.bf16.mxu0 %v6115_v51  ;;  %5208 = vmatprep.subr.bf16.mxu1 %v6116_v53 }
  0x23   :  { %1080 = vperm.xlu1 %6085, %v1062_v16   ;;  %1824 = vperm.xlu0 %6086, %v1806_v17   ;;  %v4329_v16 = vld [vmem:[%s7560_s14 + $0x70] sm:$0xff]  ;;  %v4346_v17 = vld [vmem:[%s7560_s14 + $0xf8] sm:$0xff] }
  0x24   :  { %5187 = vmatpush3.bf16.msra.mxu0 %v6117_v54  ;;  %5209 = vmatpush3.bf16.msra.mxu1 %v6118_v56 }
  0x25   :  { %5494 = vmatprep.subr.bf16.mxu1 %v6246_v20  ;;  %5474 = vmatprep.subr.bf16.mxu0 %v6246_v20 }
  0x27   :  { %1819 = vperm.xlu1 %6085, %v1805_v22   ;;  %1834 = vperm.xlu0 %6086, %v1808_v25   ;;  %v72_v22 = vshrl.u32 %v71_v21, 7  ;;  %v6123_v21 = vld [vmem:[%s7562_s6 + $0x50] sm:$0xff]  }
  0x29   :  { %v103_v23 = vsub.s32 1, %v72_v22  ;;  %v107_v24 = vsub.s32 5, %v72_v22  ;;  %v73_v25 = vsub.s32 0, %v72_v22  ;;  %v77_v26 = vsub.s32 4, %v72_v22 }
  0x2a   :  { %v137_v27 = vsub.s32 2, %v72_v22 }
  0x2b   :  { %1829 = vperm.xlu1 %6085, %v1807_v28   ;;  %1844 = vperm.xlu0 %6086, %v1810_v29   ;;  %v141_v28 = vsub.s32 6, %v72_v22  ;;  %v57_v29 = vld [vmem:[%s7563_s0] sm:$0x77]  ;;  %v6124_v22 = vld [vmem:[%s7562_s6 + $0x10] sm:$0xff]  }
  0x2c   :  { %v104_v30 = vrot.slane %v57_v29, %v103_v23  ;;  %v108_v31 = vrot.slane %v57_v29, %v107_v24  ;;  %v74_v32 = vrot.slane %v57_v29, %v73_v25  ;;  %v78_v33 = vrot.slane %v57_v29, %v77_v26  ;;  %v6126_v24 = vld [vmem:[%s7562_s6 + $0x18] sm:$0xff]   ;;  %v6128_v26 = vld [vmem:[%s7562_s6 + $0x20] sm:$0xff]  }
  0x2e   :  { %v118_v36 = vrot.slane %v108_v31, %v103_v23  ;;  %v84_v38 = vrot.slane %v74_v32, %v73_v25  ;;  %v88_v39 = vrot.slane %v78_v33, %v73_v25  ;;  %v6127_v25 = vld [vmem:[%s7562_s6 + $0x60] sm:$0xff]   ;;  %v6133_v31 = vld [vmem:[%s7562_s6 + $0x78] sm:$0xff]  }
  0x2f   :  { %1839 = vperm.xlu1 %6085, %v1809_v34   ;;  %4429 = vperm.xlu0 %6086, %v4331_v35   ;;  %v114_v35 = vrot.slane %v104_v30, %v103_v23  ;;  %v6125_v23 = vld [vmem:[%s7562_s6 + $0x58] sm:$0xff]   ;;  %v6132_v30 = vld [vmem:[%s7562_s6 + $0x30] sm:$0xff]  }
  0x30   :  { %v6134_v32 = vld [vmem:[%s7562_s6 + $0x38] sm:$0xff]  }
  0x33   :  { %1849 = vperm.xlu1 %6085, %v1811_v40   ;;  %4349 = vperm.xlu0 %6086, %v4315_v41   ;;  %v138_v40 = vrot.slane %v57_v29, %v137_v27  ;;  %v142_v41 = vrot.slane %v57_v29, %v141_v28  ;;  %v6130_v28 = vld [vmem:[%s7562_s6 + $0x28] sm:$0xff]   ;;  %v6131_v29 = vld [vmem:[%s7562_s6 + $0x70] sm:$0xff]  }
  0x35   :  { %v152_v53 = vrot.slane %v142_v41, %v137_v27 }
  0x37   :  { %4434 = vperm.xlu1 %6085, %v4332_v46   ;;  %4439 = vperm.xlu0 %6086, %v4333_v47  }
  0x3b   :  { %4354 = vperm.xlu1 %6085, %v4316_v52   ;;  %4359 = vperm.xlu0 %6086, %v4317_v55   ;;  %v148_v52 = vrot.slane %v138_v40, %v137_v27  ;;  %v6129_v27 = vld [vmem:[%s7562_s6 + $0x68] sm:$0xff]  }
  0x3f   :  { %4444 = vperm.xlu1 %6085, %v4334_v57   ;;  %4449 = vperm.xlu0 %6086, %v4335_v58  }
  0x43   :  { %4364 = vperm.xlu1 %6085, %v4318_v59   ;;  %4369 = vperm.xlu0 %6086, %v4319_v60  }
  0x47   :  { %4454 = vperm.xlu1 %6085, %v4336_v61   ;;  %4459 = vperm.xlu0 %6086, %v4337_v62  }
  0x4b   :  { %4374 = vperm.xlu1 %6085, %v4320_v63   ;;  %4379 = vperm.xlu0 %6086, %v4321_v0  }
  0x4f   :  { %4464 = vperm.xlu1 %6085, %v4338_v1   ;;  %4469 = vperm.xlu0 %6086, %v4339_v2  }
  0x53   :  { %4384 = vperm.xlu1 %6085, %v4322_v3   ;;  %4389 = vperm.xlu0 %6086, %v4323_v4  }
  0x57   :  { %4474 = vperm.xlu1 %6085, %v4340_v5   ;;  %4479 = vperm.xlu0 %6086, %v4341_v6  }
  0x5b   :  { %4394 = vperm.xlu1 %6085, %v4324_v7   ;;  %4399 = vperm.xlu0 %6086, %v4325_v8  }
  0x5f   :  { %4484 = vperm.xlu1 %6085, %v4342_v9   ;;  %4489 = vperm.xlu0 %6086, %v4343_v10  }
  0x63   :  { %4404 = vperm.xlu1 %6085, %v4326_v11   ;;  %4409 = vperm.xlu0 %6086, %v4327_v12  }
  0x67   :  { %4494 = vperm.xlu1 %6085, %v4344_v13   ;;  %4499 = vperm.xlu0 %6086, %v4345_v14  }
  0x6b   :  { %4414 = vperm.xlu1 %6085, %v4328_v15   ;;  %4419 = vperm.xlu0 %6086, %v4329_v16   ;;  %v6119_v16 = vld [vmem:[%s7562_s6 + $0x40] sm:$0xff]  }
  0x6f   :  { %4504 = vperm.xlu1 %6085, %v4346_v17   ;;  %4591 = vperm.xlu0 %6086, %v4588_v18   ;;  %v6120_v17 = vld [vmem:[%s7562_s6] sm:$0xff]   ;;  %v6121_v18 = vld [vmem:[%s7562_s6 + $0x48] sm:$0xff]  }
  0x73   :  { %4424 = vperm.xlu1 %6085, %v4330_v19   ;;  %v6122_v19 = vld [vmem:[%s7562_s6 + $0x8] sm:$0xff]  }
  0x88   :  { %v95_v34 = vpop.permute.xlu1 %94  ;;  %v63_v37 = vpop.permute.xlu0 %62 }
  0x89   :  { %v119_v42 = vmul.f32 %v114_v35, %v95_v34  ;;  %v120_v43 = vmul.f32 %v118_v36, %v95_v34  ;;  %v89_v44 = vmul.f32 %v84_v38, %v63_v37  ;;  %v90_v45 = vmul.f32 %v88_v39, %v63_v37 }
  0x8b   :  { %v123_v54 = vadd.f32 %v119_v42, %v89_v44  ;;  %v124_v55 = vadd.f32 %v120_v43, %v90_v45 }
  0x8c   :  { %v99_v46 = vpop.permute.xlu1 %98  ;;  %v68_v47 = vpop.permute.xlu0 %67 }
  0x8d   :  { %v121_v48 = vmul.f32 %v114_v35, %v99_v46  ;;  %v122_v49 = vmul.f32 %v118_v36, %v99_v46  ;;  %v91_v50 = vmul.f32 %v84_v38, %v68_v47  ;;  %v92_v51 = vmul.f32 %v88_v39, %v68_v47  ;;  %v6135_v47 = vld [vmem:[%s7562_s6 + $0x80] sm:$0xff]  }
  0x8f   :  { %v125_v56 = vadd.f32 %v121_v48, %v91_v50  ;;  %v126_v57 = vadd.f32 %v122_v49, %v92_v51  ;;  %v6136_v49 = vld [vmem:[%s7562_s6 + $0x88] sm:$0xff]   ;;  %v6137_v50 = vld [vmem:[%s7562_s6 + $0x90] sm:$0xff]   ;;  %v6138_v51 = vld [vmem:[%s7562_s6 + $0x98] sm:$0xff]  }
  0x91   :  { %v133_v58 = vpop.permute.xlu1 %132  ;;  %v129_v59 = vpop.permute.xlu0 %128 }
  0x92   :  { %v155_v60 = vmul.f32 %v148_v52, %v133_v58  ;;  %v156_v61 = vmul.f32 %v152_v53, %v133_v58  ;;  %v153_v62 = vmul.f32 %v148_v52, %v129_v59  ;;  %v154_v63 = vmul.f32 %v152_v53, %v129_v59  ;;  %v6139_v52 = vld [vmem:[%s7562_s6 + $0xa0] sm:$0xff]   ;;  %v6140_v53 = vld [vmem:[%s7562_s6 + $0xa8] sm:$0xff]  }
  0x93   :  { %v6152_v58 = vld [vmem:[%s7565_s7 + $0x28] sm:$0xff]  }
  0x94   :  { %v157_v0 = vadd.f32 %v153_v62, %v123_v54  ;;  %v158_v1 = vadd.f32 %v154_v63, %v124_v55  ;;  %v159_v2 = vadd.f32 %v155_v60, %v125_v56  ;;  %v160_v3 = vadd.f32 %v156_v61, %v126_v57  ;;  %v6141_v54 = vld [vmem:[%s7562_s6 + $0xb0] sm:$0xff]   ;;  %v6142_v55 = vld [vmem:[%s7562_s6 + $0xb8] sm:$0xff]   ;;  %v6150_v57 = vld [vmem:[%s7565_s7 + $0x20] sm:$0xff]  }
  0x95   :  { %v6143_v56 = vld [vmem:[%s7564_s4 + $0x10] sm:$0xff]  }
  0x96   :  { %v166_v4 = vpop.permute.xlu1 %165  ;;  %v171_v5 = vpop.permute.xlu0 %170 }
  0x97   :  { %v173_v6 = vadd.f32 %v166_v4, %v157_v0  ;;  %v174_v7 = vadd.f32 %v166_v4, %v158_v1  ;;  %v175_v8 = vadd.f32 %v171_v5, %v159_v2  ;;  %v176_v9 = vadd.f32 %v171_v5, %v160_v3  ;;  %v6144_v4 = vld [vmem:[%s7564_s4 + $0x18] sm:$0xff]   ;;  %v6145_v5 = vld [vmem:[%s7564_s4] sm:$0xff]  }
  0x99   :  { %v177_v10 = vmax.f32 %v173_v6, 0.0  ;;  %v178_v11 = vmax.f32 %v174_v7, 0.0  ;;  %v179_v12 = vmax.f32 %v175_v8, 0.0  ;;  %v180_v13 = vmax.f32 %v176_v9, 0.0  ;;  %v6146_v6 = vld [vmem:[%s7564_s4 + $0x8] sm:$0xff]   ;;  %v6147_v7 = vld [vmem:[%s7564_s4 + $0x20] sm:$0xff]  }
  0x9b   :  { %v214_v14 = vpack.c.bf16 %v180_v13, %v178_v11  ;;  %v213_v15 = vpack.c.bf16 %v179_v12, %v177_v10  ;;  %v6149_v13 = vld [vmem:[%s7565_s7] sm:$0xff]  }
  0x9d   :  { %343 = vmatprep.mubr.bf16.mxu0 %v214_v14  ;;  %513 = vmatprep.mubr.bf16.mxu1 %v214_v14  ;;  %v6148_v14 = vld [vmem:[%s7564_s4 + $0x28] sm:$0xff]  }
  0x9e   :  { %344 = vmatmul.mubr.bf16.vlgmr.msra.gmra.mrb[0].mxu0 %v213_v15  ;;  %514 = vmatmul.mubr.bf16.vlgmr.msra.gmra.mrb[0].mxu1 %v213_v15  ;;  %v6151_v15 = vld [vmem:[%s7565_s7 + $0x8] sm:$0xff]  }
  0x9f   :  { %5495 = vmatpush3.bf16.msra.mxu1 %v6119_v16  ;;  %5475 = vmatpush3.bf16.msra.mxu0 %v6120_v17  ;;  %v6153_v16 = vld [vmem:[%s7565_s7 + $0x10] sm:$0xff]  }
  0xa0   :  { %5496 = vmatprep.subr.bf16.mxu1 %v6246_v20  ;;  %5476 = vmatprep.subr.bf16.mxu0 %v6246_v20  ;;  %v6154_v17 = vld [vmem:[%s7565_s7 + $0x30] sm:$0xff]  }
  0xa1   :  { %5490 = vmatprep.mubr.msk.bf16.mxu0 %vm6247_vm0, %v6246_v20  ;;  %5510 = vmatprep.mubr.msk.bf16.mxu1 %vm6247_vm0, %v6246_v20 }
  0xa3   :  { %5497 = vmatpush3.bf16.msra.mxu1 %v6121_v18  ;;  %5477 = vmatpush3.bf16.msra.mxu0 %v6122_v19  ;;  %v6155_v18 = vld [vmem:[%s7565_s7 + $0x18] sm:$0xff]  }
  0xa4   :  { %5498 = vmatprep.subr.bf16.mxu1 %v6246_v20  ;;  %5478 = vmatprep.subr.bf16.mxu0 %v6246_v20  ;;  %v6156_v19 = vld [vmem:[%s7565_s7 + $0x38] sm:$0xff]  }
  0xa7   :  { %5499 = vmatpush3.bf16.msra.mxu1 %v6123_v21  ;;  %5479 = vmatpush3.bf16.msra.mxu0 %v6124_v22  ;;  %v1066_v21 = vpop.permute.xlu1 %1065 }
  0xa8   :  { %5500 = vmatprep.subr.bf16.mxu1 %v6246_v20  ;;  %5480 = vmatprep.subr.bf16.mxu0 %v6246_v20 }
  0xab   :  { %5501 = vmatpush3.bf16.msra.mxu1 %v6125_v23  ;;  %5481 = vmatpush3.bf16.msra.mxu0 %v6126_v24  ;;  %v1071_v22 = vpop.permute.xlu1 %1070  ;;  %v1076_v23 = vpop.permute.xlu0 %1075 }
  0xac   :  { %5502 = vmatprep.subr.bf16.mxu1 %v6246_v20  ;;  %5482 = vmatprep.subr.bf16.mxu0 %v6246_v20 }
  0xaf   :  { %5503 = vmatpush3.bf16.msra.mxu1 %v6127_v25  ;;  %5483 = vmatpush3.bf16.msra.mxu0 %v6128_v26 }
  0xb0   :  { %5504 = vmatprep.subr.bf16.mxu1 %v6246_v20  ;;  %5484 = vmatprep.subr.bf16.mxu0 %v6246_v20 }
  0xb3   :  { %5505 = vmatpush3.bf16.msra.mxu1 %v6129_v27  ;;  %5485 = vmatpush3.bf16.msra.mxu0 %v6130_v28  ;;  %v1081_v27 = vpop.permute.xlu1 %1080 }
  0xb4   :  { %5506 = vmatprep.subr.bf16.mxu1 %v6246_v20  ;;  %5486 = vmatprep.subr.bf16.mxu0 %v6246_v20 }
  0xb7   :  { %5507 = vmatpush3.bf16.msra.mxu1 %v6131_v29  ;;  %5487 = vmatpush3.bf16.msra.mxu0 %v6132_v30 }
  0xb8   :  { %5508 = vmatprep.subr.bf16.mxu1 %v6246_v20  ;;  %5488 = vmatprep.subr.bf16.mxu0 %v6246_v20 }
  0xbb   :  { %5509 = vmatpush3.bf16.msra.mxu1 %v6133_v31  ;;  %5489 = vmatpush3.bf16.msra.mxu0 %v6134_v32 }
  0xbc   :  { %5526 = vmatprep.subr.bf16.mxu1 %v6246_v20 }
 0x171   :  { %v5188_v33 = vpop.f32.mrb[0].mxu0  ;;  %v5210_v34 = vpop.f32.mrb[0].mxu1 }
 0x172   :  { %v5189_v35 = vpop.f32.mrb[1].mxu0  ;;  %v5211_v36 = vpop.f32.mrb[1].mxu1 }
 0x173   :  { %v5190_v37 = vadd.f32 %v5189_v35, %v5188_v33  ;;  %v5212_v38 = vadd.f32 %v5211_v36, %v5210_v34  ;;  %v5191_v39 = vpop.f32.mrb[2].mxu0  ;;  %v5213_v40 = vpop.f32.mrb[2].mxu1 }
 0x174   :  { %v5192_v41 = vpop.f32.mrb[3].mxu0  ;;  %v5214_v42 = vpop.f32.mrb[3].mxu1 }
 0x175   :  { %v522_v43 = vmax.f32 %v5190_v37, %v5212_v38  ;;  %v5193_v44 = vadd.f32 %v5192_v41, %v5191_v39  ;;  %v5215_v45 = vadd.f32 %v5214_v42, %v5213_v40  ;;  %v6157_v39 = vld [vmem:[%s7566_s10] sm:$0xff]   ;;  %v6158_v40 = vld [vmem:[%s7566_s10 + $0x8] sm:$0xff]   ;;  %v6159_v41 = vld [vmem:[%s7566_s10 + $0x10] sm:$0xff]  }
 0x177   :  { %v523_v46 = vmax.f32 %v5193_v44, %v5215_v45 }
 0x179   :  { %v524_v48 = vpack.c.bf16 %v523_v46, %v522_v43 }
 0x17b   :  { %5491 = vmatmul.mubr.bf16.vlgmr.msra.gmra.mrb[4].mxu0 %v524_v48  ;;  %5511 = vmatmul.mubr.bf16.vlgmr.msra.gmra.mrb[4].mxu1 %v524_v48 }
 0x17c   :  { %5527 = vmatpush3.bf16.msra.mxu1 %v6135_v47  ;;  %5542 = vmatprep.mubr.msk.bf16.mxu1 %vm6247_vm0, %v6246_v20 }
 0x17d   :  { %5528 = vmatprep.subr.bf16.mxu1 %v6246_v20  ;;  %5516 = vmatprep.mubr.msk.bf16.mxu0 %vm757_vm1, %v6143_v56  ;;  %v6160_v56 = vld [vmem:[%s7566_s10 + $0x18] sm:$0xff]  }
 0x180   :  { %5529 = vmatpush3.bf16.msra.mxu1 %v6136_v49 }
 0x181   :  { %5530 = vmatprep.subr.bf16.mxu1 %v6246_v20 }
 0x184   :  { %5531 = vmatpush3.bf16.msra.mxu1 %v6137_v50 }
 0x185   :  { %5532 = vmatprep.subr.bf16.mxu1 %v6246_v20 }
 0x188   :  { %5533 = vmatpush3.bf16.msra.mxu1 %v6138_v51 }
 0x189   :  { %5534 = vmatprep.subr.bf16.mxu1 %v6246_v20 }
 0x18c   :  { %5535 = vmatpush3.bf16.msra.mxu1 %v6139_v52 }
 0x18d   :  { %5536 = vmatprep.subr.bf16.mxu1 %v6246_v20 }
 0x190   :  { %5537 = vmatpush3.bf16.msra.mxu1 %v6140_v53 }
 0x191   :  { %5538 = vmatprep.subr.bf16.mxu1 %v6246_v20 }
 0x194   :  { %5539 = vmatpush3.bf16.msra.mxu1 %v6141_v54 }
 0x195   :  { %5540 = vmatprep.subr.bf16.mxu1 %v6246_v20 }
 0x198   :  { %5541 = vmatpush3.bf16.msra.mxu1 %v6142_v55 }
 0x199   :  { %5564 = vmatprep.subr.bf16.mxu1 %v6150_v57 }
 0x19b   :  { %5543 = vmatmul.mubr.bf16.vlgmr.msra.gmra.mrb[8].mxu1 %v524_v48 }
 0x19c   :  { %5565 = vmatpush3.bf16.msra.mxu1 %v6150_v57  ;;  %v6161_v57 = vld [vmem:[%s7566_s10 + $0x20] sm:$0xff]  }
 0x19d   :  { %5566 = vmatprep.subr.bf16.mxu1 %v6152_v58 }
 0x1a0   :  { %5567 = vmatpush3.bf16.msra.mxu1 %v6152_v58  ;;  %v6162_v58 = vld [vmem:[%s7566_s10 + $0x28] sm:$0xff]  }
 0x1a1   :  { %5568 = vmatprep.subr.bf16.mxu1 %v6154_v17 }
 0x1a4   :  { %5569 = vmatpush3.bf16.msra.mxu1 %v6154_v17  ;;  %v6168_v17 = vld [vmem:[%s7567_s8 + $0x8] sm:$0xff]  }
 0x1a5   :  { %5570 = vmatprep.subr.bf16.mxu1 %v6156_v19 }
 0x1a8   :  { %5571 = vmatpush3.bf16.msra.mxu1 %v6156_v19  ;;  %v6170_v19 = vld [vmem:[%s7567_s8 + $0x18] sm:$0xff]  }
 0x24e   :  { %v627_v20 = vpop.f32.mrb[4].mxu0  ;;  %v739_v59 = vpop.f32.mrb[4].mxu1 }
 0x24f   :  { %v5492_v60 = vpop.f32.mrb[5].mxu0  ;;  %v5512_v61 = vpop.f32.mrb[5].mxu1 }
 0x250   :  { %v630_v62 = vpop.f32.mrb[6].mxu0  ;;  %v742_v63 = vpop.f32.mrb[6].mxu1 }
 0x251   :  { %v634_v0 = vpack.c.bf16 %v630_v62, %v627_v20  ;;  %v746_v1 = vpack.c.bf16 %v742_v63, %v739_v59  ;;  %v5493_v2 = vpop.f32.mrb[7].mxu0  ;;  %v5513_v3 = vpop.f32.mrb[7].mxu1  ;;  %v6163_v20 = vld [vmem:[%s7567_s8 + $0x20] sm:$0xff]  }
 0x253   :  { %5514 = vmatprep.subr.bf16.mxu0 %v746_v1 }
 0x254   :  { %5515 = vmatpush3.bf16.msra.mxu0 %v746_v1 }
 0x255   :  { %5520 = vmatprep.subr.bf16.mxu0 %v634_v0 }
 0x257   :  { %5517 = vmatmul.mubr.msk.bf16.vlgmr.msra.gmra.mrb[8].mxu0 %vm757_vm1, %v6144_v4 }
 0x258   :  { %5521 = vmatpush3.bf16.msra.mxu0 %v634_v0  ;;  %5522 = vmatprep.mubr.msk.bf16.mxu0 %vm757_vm1, %v6145_v5 }
 0x263   :  { %5523 = vmatmul.mubr.msk.bf16.vlgmr.msra.gmra.mrb[8].mxu0 %vm757_vm1, %v6146_v6 }
 0x264   :  { %5548 = vmatprep.mubr.msk.bf16.mxu0 %vm757_vm1, %v6147_v7 }
 0x26e   :  { %v982_v8 = vpop.f32.mrb[8].mxu1 }
 0x26f   :  { %v5544_v9 = vpop.f32.mrb[9].mxu1 }
 0x270   :  { %v985_v10 = vpop.f32.mrb[10].mxu1 }
 0x271   :  { %v989_v11 = vpack.c.bf16 %v985_v10, %v982_v8  ;;  %v5545_v12 = vpop.f32.mrb[11].mxu1  ;;  %v6164_v10 = vld [vmem:[%s7567_s8 + $0x28] sm:$0xff]  }
 0x273   :  { %5546 = vmatprep.subr.bf16.mxu0 %v989_v11 }
 0x274   :  { %5547 = vmatpush3.bf16.msra.mxu0 %v989_v11 }
 0x275   :  { %5552 = vmatprep.subr.bf16.mxu0 %v6149_v13 }
 0x277   :  { %5549 = vmatmul.mubr.msk.bf16.vlgmr.msra.gmra.mrb[8].mxu0 %vm757_vm1, %v6148_v14 }
 0x278   :  { %5553 = vmatpush3.bf16.msra.mxu0 %v6149_v13  ;;  %v6165_v13 = vld [vmem:[%s7567_s8 + $0x30] sm:$0xff]  }
 0x279   :  { %5554 = vmatprep.subr.bf16.mxu0 %v6151_v15 }
 0x27c   :  { %5555 = vmatpush3.bf16.msra.mxu0 %v6151_v15  ;;  %v6166_v15 = vld [vmem:[%s7567_s8 + $0x38] sm:$0xff]  }
 0x27d   :  { %5556 = vmatprep.subr.bf16.mxu0 %v6153_v16 }
 0x280   :  { %5557 = vmatpush3.bf16.msra.mxu0 %v6153_v16  ;;  %v6167_v16 = vld [vmem:[%s7567_s8] sm:$0xff]  }
 0x281   :  { %5558 = vmatprep.subr.bf16.mxu0 %v6155_v18 }
 0x284   :  { %5559 = vmatpush3.bf16.msra.mxu0 %v6155_v18  ;;  %v6169_v18 = vld [vmem:[%s7567_s8 + $0x10] sm:$0xff]  }
 0x285   :  { %5576 = vmatprep.subr.bf16.mxu0 %v6157_v39 }
 0x34a   :  { %v5550_v24 = vpop.f32.mrb[8].mxu0 }
 0x34b   :  { %v1085_v25 = vadd.f32 %v5550_v24, %v1076_v23  ;;  %v1040_v26 = vpop.f32.mrb[9].mxu0  ;;  %v6173_v23 = vld [vmem:[%s7567_s8 + $0x50] sm:$0xff]   ;;  %v6174_v24 = vld [vmem:[%s7567_s8 + $0x58] sm:$0xff]  }
 0x34c   :  { %v1083_v28 = vadd.f32 %v1066_v21, %v1040_v26  ;;  %v5551_v29 = vpop.f32.mrb[10].mxu0  ;;  %v6171_v21 = vld [vmem:[%s7567_s8 + $0x40] sm:$0xff]   ;;  %v6176_v26 = vld [vmem:[%s7568_s11 + $0x8] sm:$0xff]  }
 0x34d   :  { %v1086_v30 = vadd.f32 %v5551_v29, %v1081_v27  ;;  %v1043_v31 = vpop.f32.mrb[11].mxu0  ;;  %v1089_v33 = vmax.f32 %v1085_v25, 0.0  ;;  %v6175_v25 = vld [vmem:[%s7568_s11] sm:$0xff]   ;;  %v1815_v27 = vpop.permute.xlu0 %1814 }
 0x34e   :  { %v1084_v32 = vadd.f32 %v1071_v22, %v1043_v31  ;;  %v1087_v35 = vmax.f32 %v1083_v28, 0.0  ;;  %v6172_v22 = vld [vmem:[%s7567_s8 + $0x48] sm:$0xff]   ;;  %v1820_v28 = vpop.permute.xlu1 %1819 }
 0x34f   :  { %v1090_v34 = vmax.f32 %v1086_v30, 0.0 }
 0x350   :  { %v1088_v36 = vmax.f32 %v1084_v32, 0.0 }
 0x351   :  { %v1100_v37 = vpack.c.bf16 %v1090_v34, %v1089_v33  ;;  %v1825_v29 = vpop.permute.xlu0 %1824 }
 0x352   :  { %v1099_v38 = vpack.c.bf16 %v1088_v36, %v1087_v35  ;;  %v1830_v30 = vpop.permute.xlu1 %1829 }
 0x354   :  { %5560 = vmatprep.mubr.msk.bf16.mxu0 %vm1125_vm2, %v1099_v38  ;;  %5572 = vmatprep.mubr.msk.bf16.mxu1 %vm1125_vm2, %v1099_v38 }
 0x355   :  { %5561 = vmatmul.mubr.msk.bf16.vlgmr.msra.gmra.mrb[12].mxu0 %vm1125_vm2, %v1100_v37  ;;  %5573 = vmatmul.mubr.msk.bf16.vlgmr.msra.gmra.mrb[12].mxu1 %vm1125_vm2, %v1100_v37  ;;  %v1835_v34 = vpop.permute.xlu0 %1834 }
 0x356   :  { %5577 = vmatpush3.bf16.msra.mxu0 %v6157_v39  ;;  %5596 = vmatprep.mubr.msk.bf16.mxu1 %vm1293_vm3, %v6163_v20  ;;  %v1840_v39 = vpop.permute.xlu1 %1839 }
 0x357   :  { %5578 = vmatprep.subr.bf16.mxu0 %v6158_v40 }
 0x35a   :  { %5579 = vmatpush3.bf16.msra.mxu0 %v6158_v40 }
 0x35b   :  { %5584 = vmatprep.subr.bf16.mxu0 %v6159_v41 }
 0x428   :  { %v5562_v42 = vpop.f32.mrb[12].mxu0  ;;  %v5574_v43 = vpop.f32.mrb[12].mxu1 }
 0x429   :  { %v1265_v44 = vmax.f32 %v5562_v42, %v5574_v43  ;;  %v1166_v45 = vpop.f32.mrb[13].mxu0  ;;  %v1248_v46 = vpop.f32.mrb[13].mxu1 }
 0x42a   :  { %v1263_v47 = vmax.f32 %v1166_v45, %v1248_v46  ;;  %v5563_v48 = vpop.f32.mrb[14].mxu0  ;;  %v5575_v49 = vpop.f32.mrb[14].mxu1 }
 0x42b   :  { %v1266_v50 = vmax.f32 %v5563_v48, %v5575_v49  ;;  %v1169_v51 = vpop.f32.mrb[15].mxu0  ;;  %v1251_v52 = vpop.f32.mrb[15].mxu1 }
 0x42c   :  { %v1264_v53 = vmax.f32 %v1169_v51, %v1251_v52  ;;  %v1845_v46 = vpop.permute.xlu0 %1844  ;;  %v1850_v51 = vpop.permute.xlu1 %1849 }
 0x42d   :  { %v1268_v54 = vpack.c.bf16 %v1266_v50, %v1265_v44 }
 0x42e   :  { %v1267_v55 = vpack.c.bf16 %v1264_v53, %v1263_v47 }
 0x430   :  { %5580 = vmatprep.mubr.msk.bf16.mxu0 %vm1293_vm3, %v1267_v55 }
 0x431   :  { %5581 = vmatmul.mubr.msk.bf16.vlgmr.msra.gmra.mrb[16].mxu0 %vm1293_vm3, %v1268_v54 }
 0x432   :  { %5585 = vmatpush3.bf16.msra.mxu0 %v6159_v41  ;;  %5588 = vmatprep.mubr.msk.bf16.mxu0 %vm1293_vm3, %v1267_v55 }
 0x433   :  { %5586 = vmatprep.subr.bf16.mxu0 %v6160_v56 }
 0x436   :  { %5587 = vmatpush3.bf16.msra.mxu0 %v6160_v56 }
 0x437   :  { %5616 = vmatprep.subr.bf16.mxu0 %v6161_v57 }
 0x439   :  { %5589 = vmatmul.mubr.msk.bf16.vlgmr.msra.gmra.mrb[20].mxu0 %vm1293_vm3, %v1268_v54 }
 0x43a   :  { %5617 = vmatpush3.bf16.msra.mxu0 %v6161_v57  ;;  %5620 = vmatprep.mubr.msk.bf16.mxu0 %vm1293_vm3, %v1267_v55 }
 0x43b   :  { %5618 = vmatprep.subr.bf16.mxu0 %v6162_v58 }
 0x43e   :  { %5619 = vmatpush3.bf16.msra.mxu0 %v6162_v58 }
 0x43f   :  { %5636 = vmatprep.subr.bf16.mxu0 %v6175_v25 }
 0x441   :  { %5621 = vmatmul.mubr.msk.bf16.vlgmr.msra.gmra.mrb[24].mxu0 %vm1293_vm3, %v1268_v54 }
 0x442   :  { %5637 = vmatpush3.bf16.msra.mxu0 %v6175_v25 }
 0x443   :  { %5646 = vmatprep.subr.bf16.mxu0 %v6176_v26 }
 0x504   :  { %v5582_v59 = vpop.f32.mrb[16].mxu0 }
 0x505   :  { %v1334_v60 = vpop.f32.mrb[17].mxu0 }
 0x506   :  { %v5583_v61 = vpop.f32.mrb[18].mxu0 }
 0x507   :  { %v1350_v62 = vpack.c.bf16 %v5583_v61, %v5582_v59  ;;  %v1337_v63 = vpop.f32.mrb[19].mxu0 }
 0x508   :  { %v1349_v0 = vpack.c.bf16 %v1337_v63, %v1334_v60 }
 0x50c   :  { %v5590_v1 = vpop.f32.mrb[20].mxu0 }
 0x50d   :  { %v1411_v2 = vpop.f32.mrb[21].mxu0 }
 0x50e   :  { %v5591_v3 = vpop.f32.mrb[22].mxu0 }
 0x50f   :  { %v1427_v4 = vpack.c.bf16 %v5591_v3, %v5590_v1  ;;  %v1414_v5 = vpop.f32.mrb[23].mxu0 }
 0x510   :  { %v1426_v6 = vpack.c.bf16 %v1414_v5, %v1411_v2 }
 0x512   :  { %5592 = vmatprep.subr.bf16.mxu1 %v1426_v6 }
 0x513   :  { %5593 = vmatpush3.bf16.msra.mxu1 %v1426_v6 }
 0x514   :  { %5594 = vmatprep.subr.bf16.mxu1 %v1427_v4  ;;  %v5622_v7 = vpop.f32.mrb[24].mxu0 }
 0x515   :  { %v1682_v8 = vpop.f32.mrb[25].mxu0 }
 0x516   :  { %v5623_v9 = vpop.f32.mrb[26].mxu0 }
 0x517   :  { %v1698_v11 = vpack.c.bf16 %v5623_v9, %v5622_v7  ;;  %5595 = vmatpush3.bf16.msra.mxu1 %v1427_v4  ;;  %v1685_v12 = vpop.f32.mrb[27].mxu0 }
 0x518   :  { %v1697_v14 = vpack.c.bf16 %v1685_v12, %v1682_v8  ;;  %5604 = vmatprep.subr.bf16.mxu1 %v1349_v0 }
 0x51a   :  { %5597 = vmatmul.mubr.msk.bf16.vlgmr.msra.gmra.mrb[16].mxu1 %vm1293_vm3, %v6164_v10 }
 0x51b   :  { %5605 = vmatpush3.bf16.msra.mxu1 %v1349_v0  ;;  %5600 = vmatprep.mubr.msk.bf16.mxu1 %vm1293_vm3, %v6165_v13 }
 0x51c   :  { %5606 = vmatprep.subr.bf16.mxu1 %v1350_v62 }
 0x51f   :  { %5607 = vmatpush3.bf16.msra.mxu1 %v1350_v62  ;;  %v6177_v62 = vld [vmem:[%s7569_s12] sm:$0xff]  }
 0x520   :  { %5624 = vmatprep.subr.bf16.mxu1 %v1697_v14 }
 0x522   :  { %5601 = vmatmul.mubr.msk.bf16.gmra.mrb[20].mxu1 %vm1293_vm3, %v6166_v15 }
 0x523   :  { %5608 = vmatprep.mubr.msk.bf16.mxu1 %vm1293_vm3, %v6167_v16 }
 0x52a   :  { %5609 = vmatmul.mubr.msk.bf16.vlgmr.msra.gmra.mrb[16].mxu1 %vm1293_vm3, %v6168_v17 }
 0x52b   :  { %5625 = vmatpush3.bf16.msra.mxu1 %v1697_v14  ;;  %5612 = vmatprep.mubr.msk.bf16.mxu1 %vm1293_vm3, %v6169_v18 }
 0x52c   :  { %5626 = vmatprep.subr.bf16.mxu1 %v1698_v11 }
 0x52f   :  { %5627 = vmatpush3.bf16.msra.mxu1 %v1698_v11 }
 0x532   :  { %5613 = vmatmul.mubr.msk.bf16.gmra.mrb[20].mxu1 %vm1293_vm3, %v6170_v19 }
 0x533   :  { %5628 = vmatprep.mubr.msk.bf16.mxu1 %vm1293_vm3, %v6171_v21 }
 0x53a   :  { %5629 = vmatmul.mubr.msk.bf16.vlgmr.msra.gmra.mrb[16].mxu1 %vm1293_vm3, %v6172_v22 }
 0x53b   :  { %5632 = vmatprep.mubr.msk.bf16.mxu1 %vm1293_vm3, %v6173_v23 }
 0x542   :  { %5633 = vmatmul.mubr.msk.bf16.gmra.mrb[20].mxu1 %vm1293_vm3, %v6174_v24 }
 0x543   :  { %5664 = vmatprep.mubr.msk.bf16.mxu1 %vm1125_vm2, %v6177_v62  ;;  %v6213_v62 = vld [vmem:[%s7569_s12 + $0x120] sm:$0xff]  }
 0x60d   :  { %v5630_v31 = vpop.f32.mrb[16].mxu1 }
 0x60e   :  { %v1854_v32 = vadd.f32 %v5630_v31, %v1825_v29  ;;  %v1765_v33 = vpop.f32.mrb[17].mxu1  ;;  %v6179_v29 = vld [vmem:[%s7569_s12 + $0x10] sm:$0xff]   ;;  %v6181_v31 = vld [vmem:[%s7569_s12 + $0x20] sm:$0xff]  }
 0x60f   :  { %v1852_v35 = vadd.f32 %v1815_v27, %v1765_v33  ;;  %v5631_v36 = vpop.f32.mrb[18].mxu1  ;;  %v6183_v33 = vld [vmem:[%s7569_s12 + $0x30] sm:$0xff]  }
 0x610   :  { %v1855_v37 = vadd.f32 %v5631_v36, %v1830_v30  ;;  %v1768_v38 = vpop.f32.mrb[19].mxu1  ;;  %v1862_v41 = vmax.f32 %v1854_v32, 0.0  ;;  %v6180_v30 = vld [vmem:[%s7569_s12 + $0x18] sm:$0xff]   ;;  %v6182_v32 = vld [vmem:[%s7569_s12 + $0x28] sm:$0xff]  }
 0x611   :  { %v1853_v40 = vadd.f32 %v1820_v28, %v1768_v38  ;;  %v1860_v43 = vmax.f32 %v1852_v35, 0.0  ;;  %v6178_v28 = vld [vmem:[%s7569_s12 + $0x8] sm:$0xff]   ;;  %v6185_v35 = vld [vmem:[%s7569_s12 + $0x40] sm:$0xff]   ;;  %v6188_v38 = vld [vmem:[%s7569_s12 + $0x58] sm:$0xff]  }
 0x612   :  { %v1863_v42 = vmax.f32 %v1855_v37, 0.0  ;;  %v6186_v36 = vld [vmem:[%s7569_s12 + $0x48] sm:$0xff]   ;;  %v6187_v37 = vld [vmem:[%s7569_s12 + $0x50] sm:$0xff]  }
 0x613   :  { %v1861_v44 = vmax.f32 %v1853_v40, 0.0  ;;  %v6190_v40 = vld [vmem:[%s7569_s12 + $0x68] sm:$0xff]  }
 0x614   :  { %v1871_v45 = vpack.c.bf16 %v1863_v42, %v1862_v41  ;;  %v6191_v41 = vld [vmem:[%s7569_s12 + $0x70] sm:$0xff]   ;;  %v6192_v42 = vld [vmem:[%s7569_s12 + $0x78] sm:$0xff]  }
 0x615   :  { %v1870_v47 = vpack.c.bf16 %v1861_v44, %v1860_v43  ;;  %v5634_v48 = vpop.f32.mrb[20].mxu1  ;;  %v6193_v43 = vld [vmem:[%s7569_s12 + $0x80] sm:$0xff]   ;;  %v6194_v44 = vld [vmem:[%s7569_s12 + $0x88] sm:$0xff]  }
 0x616   :  { %v1858_v49 = vadd.f32 %v5634_v48, %v1845_v46  ;;  %v1781_v50 = vpop.f32.mrb[21].mxu1  ;;  %v6196_v46 = vld [vmem:[%s7569_s12 + $0x98] sm:$0xff]   ;;  %v6198_v48 = vld [vmem:[%s7569_s12 + $0xa8] sm:$0xff]  }
 0x617   :  { %v1856_v52 = vadd.f32 %v1835_v34, %v1781_v50  ;;  %v5635_v53 = vpop.f32.mrb[22].mxu1  ;;  %5638 = vmatprep.mubr.msk.bf16.mxu0 %vm757_vm1, %v1870_v47  ;;  %v6184_v34 = vld [vmem:[%s7569_s12 + $0x38] sm:$0xff]  }
 0x618   :  { %v1859_v54 = vadd.f32 %v5635_v53, %v1850_v51  ;;  %v1784_v55 = vpop.f32.mrb[23].mxu1  ;;  %5639 = vmatmul.mubr.msk.bf16.vlgmr.msra.gmra.mrb[28].mxu0 %vm757_vm1, %v1871_v45  ;;  %v1866_v57 = vmax.f32 %v1858_v49, 0.0  ;;  %v6199_v49 = vld [vmem:[%s7569_s12 + $0xb0] sm:$0xff]   ;;  %v6200_v50 = vld [vmem:[%s7569_s12 + $0xb8] sm:$0xff]   ;;  %v6201_v51 = vld [vmem:[%s7569_s12 + $0xc0] sm:$0xff]  }
 0x619   :  { %v1857_v56 = vadd.f32 %v1840_v39, %v1784_v55  ;;  %5647 = vmatpush3.bf16.msra.mxu0 %v6176_v26  ;;  %v1864_v20 = vmax.f32 %v1856_v52, 0.0  ;;  %v6189_v39 = vld [vmem:[%s7569_s12 + $0x60] sm:$0xff]   ;;  %v6202_v52 = vld [vmem:[%s7569_s12 + $0xc8] sm:$0xff]   ;;  %v6203_v53 = vld [vmem:[%s7569_s12 + $0xd0] sm:$0xff]  }
 0x61a   :  { %v1867_v58 = vmax.f32 %v1859_v54, 0.0  ;;  %v6204_v54 = vld [vmem:[%s7569_s12 + $0xd8] sm:$0xff]   ;;  %v6205_v55 = vld [vmem:[%s7569_s12 + $0xe0] sm:$0xff]  }
 0x61b   :  { %v1865_v59 = vmax.f32 %v1857_v56, 0.0  ;;  %v6206_v56 = vld [vmem:[%s7569_s12 + $0xe8] sm:$0xff]  }
 0x61c   :  { %v1873_v60 = vpack.c.bf16 %v1867_v58, %v1866_v57  ;;  %v6207_v57 = vld [vmem:[%s7569_s12 + $0xf0] sm:$0xff]   ;;  %v6208_v58 = vld [vmem:[%s7569_s12 + $0xf8] sm:$0xff]  }
 0x61d   :  { %v1872_v61 = vpack.c.bf16 %v1865_v59, %v1864_v20  ;;  %v6209_v20 = vld [vmem:[%s7569_s12 + $0x100] sm:$0xff]   ;;  %v6210_v59 = vld [vmem:[%s7569_s12 + $0x108] sm:$0xff]  }
 0x61f   :  { %5642 = vmatprep.mubr.msk.bf16.mxu0 %vm757_vm1, %v1872_v61 }
 0x620   :  { %5643 = vmatmul.mubr.msk.bf16.gmra.mrb[32].mxu0 %vm757_vm1, %v1873_v60 }
 0x621   :  { %5648 = vmatprep.mubr.msk.bf16.mxu0 %vm757_vm1, %v1870_v47  ;;  %v6197_v47 = vld [vmem:[%s7569_s12 + $0xa0] sm:$0xff]  }
 0x628   :  { %5649 = vmatmul.mubr.msk.bf16.vlgmr.msra.gmra.mrb[36].mxu0 %vm757_vm1, %v1871_v45  ;;  %v6195_v45 = vld [vmem:[%s7569_s12 + $0x90] sm:$0xff]  }
 0x629   :  { %5652 = vmatprep.mubr.msk.bf16.mxu0 %vm757_vm1, %v1872_v61  ;;  %v6212_v61 = vld [vmem:[%s7569_s12 + $0x118] sm:$0xff]  }
 0x630   :  { %5653 = vmatmul.mubr.msk.bf16.gmra.mrb[40].mxu0 %vm757_vm1, %v1873_v60  ;;  %v6211_v60 = vld [vmem:[%s7569_s12 + $0x110] sm:$0xff]  }
 0x6eb   :  { %v5640_v63 = vpop.f32.mrb[28].mxu0 }
 0x6ec   :  { %v1926_v0 = vpop.f32.mrb[29].mxu0 }
 0x6ed   :  { %v5641_v1 = vpop.f32.mrb[30].mxu0 }
 0x6ee   :  { %v1929_v2 = vpop.f32.mrb[31].mxu0 }
 0x6f3   :  { %v5644_v3 = vpop.f32.mrb[32].mxu0 }
 0x6f4   :  { %v1942_v4 = vpop.f32.mrb[33].mxu0 }
 0x6f5   :  { %v5645_v5 = vpop.f32.mrb[34].mxu0 }
 0x6f6   :  { %v1945_v6 = vpop.f32.mrb[35].mxu0 }
 0x6fb   :  { %v5650_v7 = vpop.f32.mrb[36].mxu0 }
 0x6fc   :  { %v2033_v8 = vmax.f32 %v5640_v63, %v5650_v7  ;;  %v2000_v9 = vpop.f32.mrb[37].mxu0  ;;  %v6214_v63 = vld [vmem:[%s7569_s12 + $0x128] sm:$0xff]   ;;  %v6220_v7 = vld [vmem:[%s7569_s12 + $0x158] sm:$0xff]  }
 0x6fd   :  { %v2031_v10 = vmax.f32 %v1926_v0, %v2000_v9  ;;  %v5651_v11 = vpop.f32.mrb[38].mxu0  ;;  %v6215_v0 = vld [vmem:[%s7569_s12 + $0x130] sm:$0xff]   ;;  %v6222_v9 = vld [vmem:[%s7569_s12 + $0x168] sm:$0xff]  }
 0x6fe   :  { %v2034_v12 = vmax.f32 %v5641_v1, %v5651_v11  ;;  %v2003_v13 = vpop.f32.mrb[39].mxu0  ;;  %v6216_v1 = vld [vmem:[%s7569_s12 + $0x138] sm:$0xff]  }
 0x6ff   :  { %v2032_v14 = vmax.f32 %v1929_v2, %v2003_v13  ;;  %v6217_v2 = vld [vmem:[%s7569_s12 + $0x140] sm:$0xff]   ;;  %v6224_v11 = vld [vmem:[%s7569_s12 + $0x178] sm:$0xff]  }
 0x700   :  { %v6828_v15 = vpack.c.bf16 %v2034_v12, %v2033_v8  ;;  %v6221_v8 = vld [vmem:[%s7569_s12 + $0x160] sm:$0xff]  }
 0x701   :  { %v6830_v16 = vpack.c.bf16 %v2032_v14, %v2031_v10  ;;  %v6223_v10 = vld [vmem:[%s7569_s12 + $0x170] sm:$0xff]   ;;  %v6225_v12 = vld [vmem:[%s7569_s12 + $0x180] sm:$0xff]   ;;  %v6226_v14 = vld [vmem:[%s7569_s12 + $0x188] sm:$0xff]  }
 0x702   :  { %v7068_v13 = vld [vmem:[%s7570_s13] sm:$0xf] }
 0x703   :  { %v5654_v17 = vpop.f32.mrb[40].mxu0  ;;  %5656 = vmatprep.subr.bf16.mxu1 %v6830_v16 }
 0x704   :  { %v2037_v18 = vmax.f32 %v5644_v3, %v5654_v17  ;;  %v2016_v19 = vpop.f32.mrb[41].mxu0  ;;  %5657 = vmatpush3.bf16.msra.mxu1 %v6830_v16  ;;  %v4975_v3 = vld [vmem:[%s7570_s13 + $0x4] sm:$0xf] }
 0x705   :  { %v2035_v21 = vmax.f32 %v1942_v4, %v2016_v19  ;;  %v5655_v22 = vpop.f32.mrb[42].mxu0  ;;  %5658 = vmatprep.subr.bf16.mxu1 %v6828_v15  ;;  %6072 = vmatprep.subr.msk.bf16.mxu0 %vm2770_vm4, %v4975_v3  ;;  %v2772_v4 = vsel %vm2770_vm4, %v4975_v3, 0  ;;  %v6229_v17 = vld [vmem:[%s7569_s12 + $0x1a0] sm:$0xff]   ;;  %v6231_v19 = vld [vmem:[%s7569_s12 + $0x1b0] sm:$0xff]  }
 0x706   :  { %v2038_v23 = vmax.f32 %v5645_v5, %v5655_v22  ;;  %v2019_v24 = vpop.f32.mrb[43].mxu0  ;;  %5737 = vmatpush3.bf16.msra.mxu0 %v2772_v4  ;;  %v6218_v5 = vld [vmem:[%s7569_s12 + $0x148] sm:$0xff]  }
 0x707   :  { %v2036_v25 = vmax.f32 %v1945_v6, %v2019_v24  ;;  %v6219_v6 = vld [vmem:[%s7569_s12 + $0x150] sm:$0xff]   ;;  %6073 = vmatprep.subr.msk.bf16.mxu0 %vm2770_vm4, %v7068_v13 }
 0x708   :  { %v6835_v26 = vpack.c.bf16 %v2038_v23, %v2037_v18  ;;  %5659 = vmatpush3.bf16.msra.mxu1 %v6828_v15  ;;  %v6230_v18 = vld [vmem:[%s7569_s12 + $0x1a8] sm:$0xff]   ;;  %v6232_v23 = vld [vmem:[%s7569_s12 + $0x1b8] sm:$0xff]  }
 0x709   :  { %v6838_v27 = vpack.c.bf16 %v2036_v25, %v2035_v21  ;;  %v6233_v25 = vld [vmem:[%s7569_s12 + $0x1c0] sm:$0xff]  }
 0x70b   :  { %5660 = vmatprep.subr.bf16.mxu1 %v6838_v27 }
 0x70c   :  { %5661 = vmatpush3.bf16.msra.mxu1 %v6838_v27 }
 0x70d   :  { %5662 = vmatprep.subr.bf16.mxu1 %v6835_v26 }
 0x710   :  { %5663 = vmatpush3.bf16.msra.mxu1 %v6835_v26 }
 0x711   :  { %5696 = vmatprep.subr.bf16.mxu1 %v6830_v16 }
 0x713   :  { %5665 = vmatmul.mubr.msk.bf16.vlgmr.msra.gmra.mrb[24].mxu1 %vm1125_vm2, %v6178_v28 }
 0x714   :  { %5697 = vmatpush3.bf16.msra.mxu1 %v6830_v16  ;;  %5668 = vmatprep.mubr.msk.bf16.mxu1 %vm1125_vm2, %v6179_v29 }
 0x715   :  { %5698 = vmatprep.subr.bf16.mxu1 %v6828_v15 }
 0x718   :  { %5699 = vmatpush3.bf16.msra.mxu1 %v6828_v15 }
 0x719   :  { %5700 = vmatprep.subr.bf16.mxu1 %v6838_v27 }
 0x71b   :  { %5669 = vmatmul.mubr.msk.bf16.gmra.mrb[28].mxu1 %vm1125_vm2, %v6180_v30 }
 0x71c   :  { %5701 = vmatpush3.bf16.msra.mxu1 %v6838_v27  ;;  %5672 = vmatprep.mubr.msk.bf16.mxu1 %vm1125_vm2, %v6181_v31  ;;  %v6234_v31 = vld [vmem:[%s7569_s12 + $0x1c8] sm:$0xff]  }
 0x71d   :  { %5702 = vmatprep.subr.bf16.mxu1 %v6835_v26 }
 0x720   :  { %5703 = vmatpush3.bf16.msra.mxu1 %v6835_v26 }
 0x721   :  { %5804 = vmatprep.subr.bf16.mxu1 %v6830_v16 }
 0x723   :  { %5673 = vmatmul.mubr.msk.bf16.gmra.mrb[32].mxu1 %vm1125_vm2, %v6182_v32 }
 0x724   :  { %5676 = vmatprep.mubr.msk.bf16.mxu1 %vm1125_vm2, %v6183_v33  ;;  %v6235_v33 = vld [vmem:[%s7569_s12 + $0x1d0] sm:$0xff]  }
 0x72b   :  { %5677 = vmatmul.mubr.msk.bf16.gmra.mrb[36].mxu1 %vm1125_vm2, %v6184_v34 }
 0x72c   :  { %5680 = vmatprep.mubr.msk.bf16.mxu1 %vm1125_vm2, %v6185_v35 }
 0x733   :  { %5681 = vmatmul.mubr.msk.bf16.gmra.mrb[40].mxu1 %vm1125_vm2, %v6186_v36 }
 0x734   :  { %5684 = vmatprep.mubr.msk.bf16.mxu1 %vm1125_vm2, %v6187_v37 }
 0x73b   :  { %5685 = vmatmul.mubr.msk.bf16.gmra.mrb[44].mxu1 %vm1125_vm2, %v6188_v38 }
 0x73c   :  { %5688 = vmatprep.mubr.msk.bf16.mxu1 %vm1125_vm2, %v6189_v39  ;;  %v6236_v39 = vld [vmem:[%s7569_s12 + $0x1d8] sm:$0xff]  }
 0x743   :  { %5689 = vmatmul.mubr.msk.bf16.gmra.mrb[48].mxu1 %vm1125_vm2, %v6190_v40 }
 0x744   :  { %5692 = vmatprep.mubr.msk.bf16.mxu1 %vm1125_vm2, %v6191_v41  ;;  %v6237_v41 = vld [vmem:[%s7569_s12 + $0x1e0] sm:$0xff]  }
 0x74b   :  { %5693 = vmatmul.mubr.msk.bf16.gmra.mrb[52].mxu1 %vm1125_vm2, %v6192_v42 }
 0x74c   :  { %5704 = vmatprep.mubr.msk.bf16.mxu1 %vm1125_vm2, %v6193_v43 }
 0x753   :  { %5705 = vmatmul.mubr.msk.bf16.vlgmr.msra.gmra.mrb[56].mxu1 %vm1125_vm2, %v6194_v44 }
 0x754   :  { %5805 = vmatpush3.bf16.msra.mxu1 %v6830_v16  ;;  %5708 = vmatprep.mubr.msk.bf16.mxu1 %vm1125_vm2, %v6195_v45 }
 0x755   :  { %5806 = vmatprep.subr.bf16.mxu1 %v6828_v15 }
 0x758   :  { %5807 = vmatpush3.bf16.msra.mxu1 %v6828_v15 }
 0x759   :  { %5808 = vmatprep.subr.bf16.mxu1 %v6838_v27 }
 0x75b   :  { %5709 = vmatmul.mubr.msk.bf16.gmra.mrb[60].mxu1 %vm1125_vm2, %v6196_v46 }
 0x75c   :  { %5809 = vmatpush3.bf16.msra.mxu1 %v6838_v27  ;;  %5712 = vmatprep.mubr.msk.bf16.mxu1 %vm1125_vm2, %v6197_v47  ;;  %v6238_v47 = vld [vmem:[%s7569_s12 + $0x1e8] sm:$0xff]  }
 0x75d   :  { %5810 = vmatprep.subr.bf16.mxu1 %v6835_v26 }
 0x760   :  { %5811 = vmatpush3.bf16.msra.mxu1 %v6835_v26 }
 0x761   :  { %5878 = vmatprep.subr.bf16.mxu1 %v6830_v16 }
 0x763   :  { %5713 = vmatmul.mubr.msk.bf16.gmra.mrb[64].mxu1 %vm1125_vm2, %v6198_v48 }
 0x764   :  { %5716 = vmatprep.mubr.msk.bf16.mxu1 %vm1125_vm2, %v6199_v49  ;;  %v6239_v49 = vld [vmem:[%s7569_s12 + $0x1f0] sm:$0xff]  }
 0x76b   :  { %5717 = vmatmul.mubr.msk.bf16.gmra.mrb[68].mxu1 %vm1125_vm2, %v6200_v50 }
 0x76c   :  { %5720 = vmatprep.mubr.msk.bf16.mxu1 %vm1125_vm2, %v6201_v51 }
 0x773   :  { %5721 = vmatmul.mubr.msk.bf16.gmra.mrb[72].mxu1 %vm1125_vm2, %v6202_v52 }
 0x774   :  { %5724 = vmatprep.mubr.msk.bf16.mxu1 %vm1125_vm2, %v6203_v53 }
 0x77b   :  { %5725 = vmatmul.mubr.msk.bf16.gmra.mrb[76].mxu1 %vm1125_vm2, %v6204_v54 }
 0x77c   :  { %5728 = vmatprep.mubr.msk.bf16.mxu1 %vm1125_vm2, %v6205_v55  ;;  %v6240_v55 = vld [vmem:[%s7569_s12 + $0x1f8] sm:$0xff]  }
 0x783   :  { %5729 = vmatmul.mubr.msk.bf16.gmra.mrb[80].mxu1 %vm1125_vm2, %v6206_v56 }
 0x784   :  { %5732 = vmatprep.mubr.msk.bf16.mxu1 %vm1125_vm2, %v6207_v57 }
 0x78b   :  { %5733 = vmatmul.mubr.msk.bf16.gmra.mrb[84].mxu1 %vm1125_vm2, %v6208_v58 }
 0x78c   :  { %5812 = vmatprep.mubr.msk.bf16.mxu1 %vm1125_vm2, %v6209_v20 }
 0x793   :  { %5813 = vmatmul.mubr.msk.bf16.vlgmr.msra.gmra.mrb[88].mxu1 %vm1125_vm2, %v6210_v59 }
 0x794   :  { %5879 = vmatpush3.bf16.msra.mxu1 %v6830_v16  ;;  %5816 = vmatprep.mubr.msk.bf16.mxu1 %vm1125_vm2, %v6211_v60  ;;  %v6228_v16 = vld [vmem:[%s7569_s12 + $0x198] sm:$0xff]  }
 0x795   :  { %5880 = vmatprep.subr.bf16.mxu1 %v6828_v15 }
 0x798   :  { %5881 = vmatpush3.bf16.msra.mxu1 %v6828_v15  ;;  %v6227_v15 = vld [vmem:[%s7569_s12 + $0x190] sm:$0xff]  }
 0x799   :  { %5882 = vmatprep.subr.bf16.mxu1 %v6838_v27 }
 0x79b   :  { %5817 = vmatmul.mubr.msk.bf16.gmra.mrb[92].mxu1 %vm1125_vm2, %v6212_v61 }
 0x79c   :  { %5883 = vmatpush3.bf16.msra.mxu1 %v6838_v27  ;;  %5820 = vmatprep.mubr.msk.bf16.mxu1 %vm1125_vm2, %v6213_v62 }
 0x79d   :  { %5884 = vmatprep.subr.bf16.mxu1 %v6835_v26 }
 0x7a0   :  { %5885 = vmatpush3.bf16.msra.mxu1 %v6835_v26 }
 0x7a3   :  { %5821 = vmatmul.mubr.msk.bf16.gmra.mrb[96].mxu1 %vm1125_vm2, %v6214_v63 }
 0x7a4   :  { %5824 = vmatprep.mubr.msk.bf16.mxu1 %vm1125_vm2, %v6215_v0 }
 0x7ab   :  { %5825 = vmatmul.mubr.msk.bf16.gmra.mrb[100].mxu1 %vm1125_vm2, %v6216_v1 }
 0x7ac   :  { %5828 = vmatprep.mubr.msk.bf16.mxu1 %vm1125_vm2, %v6217_v2 }
 0x7b3   :  { %5829 = vmatmul.mubr.msk.bf16.gmra.mrb[104].mxu1 %vm1125_vm2, %v6218_v5 }
 0x7b4   :  { %5832 = vmatprep.mubr.msk.bf16.mxu1 %vm1125_vm2, %v6219_v6 }
 0x7bb   :  { %5833 = vmatmul.mubr.msk.bf16.gmra.mrb[108].mxu1 %vm1125_vm2, %v6220_v7 }
 0x7bc   :  { %5836 = vmatprep.mubr.msk.bf16.mxu1 %vm1125_vm2, %v6221_v8 }
 0x7c3   :  { %5837 = vmatmul.mubr.msk.bf16.gmra.mrb[112].mxu1 %vm1125_vm2, %v6222_v9 }
 0x7c4   :  { %5840 = vmatprep.mubr.msk.bf16.mxu1 %vm1125_vm2, %v6223_v10 }
 0x7cb   :  { %5841 = vmatmul.mubr.msk.bf16.gmra.mrb[116].mxu1 %vm1125_vm2, %v6224_v11 }
 0x7cc   :  { %5886 = vmatprep.mubr.msk.bf16.mxu1 %vm1125_vm2, %v6225_v12 }
 0x7d3   :  { %5887 = vmatmul.mubr.msk.bf16.vlgmr.msra.gmra.mrb[120].mxu1 %vm1125_vm2, %v6226_v14 }
 0x7d4   :  { %5890 = vmatprep.mubr.msk.bf16.mxu1 %vm1125_vm2, %v6227_v15 }
 0x7db   :  { %5891 = vmatmul.mubr.msk.bf16.gmra.mrb[124].mxu1 %vm1125_vm2, %v6228_v16 }
 0x7dc   :  { %5894 = vmatprep.mubr.msk.bf16.mxu1 %vm1125_vm2, %v6229_v17 }
 0x7e3   :  { %5895 = vmatmul.mubr.msk.bf16.gmra.mrb[128].mxu1 %vm1125_vm2, %v6230_v18 }
 0x7e4   :  { %5898 = vmatprep.mubr.msk.bf16.mxu1 %vm1125_vm2, %v6231_v19 }
 0x7e6   :  { %v7096_v21 = vpop.f32.mrb[24].mxu1 }
 0x7e7   :  { %v7098_v22 = vpop.f32.mrb[25].mxu1 }
 0x7e8   :  { %v7103_v24 = vpop.f32.mrb[26].mxu1 }
 0x7e9   :  { %v2366_v26 = vpack.c.bf16 %v7103_v24, %v7096_v21  ;;  %v7110_v27 = vpop.f32.mrb[27].mxu1 }
 0x7ea   :  { %v2365_v28 = vpack.c.bf16 %v7110_v27, %v7098_v22  ;;  %v7274_v22 = vld [vmem:[%s7570_s13 + $0xc] sm:$0xf] }
 0x7eb   :  { %5899 = vmatmul.mubr.msk.bf16.gmra.mrb[132].mxu1 %vm1125_vm2, %v6232_v23  ;;  %v2984_v23 = vsel %vm2770_vm4, %v7068_v13, 0 }
 0x7ec   :  { %5902 = vmatprep.mubr.msk.bf16.mxu1 %vm1125_vm2, %v6233_v25  ;;  %v7234_v25 = vld [vmem:[%s7570_s13 + $0x8] sm:$0xf] }
 0x7ee   :  { %v7116_v29 = vpop.f32.mrb[28].mxu1 }
 0x7ef   :  { %v7118_v30 = vpop.f32.mrb[29].mxu1 }
 0x7f0   :  { %v7123_v32 = vpop.f32.mrb[30].mxu1 }
 0x7f1   :  { %v2368_v34 = vpack.c.bf16 %v7123_v32, %v7116_v29  ;;  %v7130_v35 = vpop.f32.mrb[31].mxu1 }
 0x7f2   :  { %v2367_v36 = vpack.c.bf16 %v7130_v35, %v7118_v30 }
 0x7f3   :  { %5903 = vmatmul.mubr.msk.bf16.gmra.mrb[136].mxu1 %vm1125_vm2, %v6234_v31 }
 0x7f4   :  { %5906 = vmatprep.mubr.msk.bf16.mxu1 %vm1125_vm2, %v6235_v33 }
 0x7f6   :  { %v7136_v37 = vpop.f32.mrb[32].mxu1 }
 0x7f7   :  { %v7138_v38 = vpop.f32.mrb[33].mxu1 }
 0x7f8   :  { %v7143_v40 = vpop.f32.mrb[34].mxu1 }
 0x7f9   :  { %v2370_v42 = vpack.c.bf16 %v7143_v40, %v7136_v37  ;;  %v7150_v43 = vpop.f32.mrb[35].mxu1 }
 0x7fa   :  { %v2369_v44 = vpack.c.bf16 %v7150_v43, %v7138_v38 }
 0x7fb   :  { %5907 = vmatmul.mubr.msk.bf16.gmra.mrb[140].mxu1 %vm1125_vm2, %v6236_v39 }
 0x7fc   :  { %5910 = vmatprep.mubr.msk.bf16.mxu1 %vm1125_vm2, %v6237_v41 }
 0x7fe   :  { %v7156_v45 = vpop.f32.mrb[36].mxu1 }
 0x7ff   :  { %v7158_v46 = vpop.f32.mrb[37].mxu1 }
 0x800   :  { %v7163_v48 = vpop.f32.mrb[38].mxu1 }
 0x801   :  { %v2372_v50 = vpack.c.bf16 %v7163_v48, %v7156_v45  ;;  %v7170_v51 = vpop.f32.mrb[39].mxu1 }
 0x802   :  { %v2371_v52 = vpack.c.bf16 %v7170_v51, %v7158_v46 }
 0x803   :  { %5911 = vmatmul.mubr.msk.bf16.gmra.mrb[144].mxu1 %vm1125_vm2, %v6238_v47 }
 0x804   :  { %5914 = vmatprep.mubr.msk.bf16.mxu1 %vm1125_vm2, %v6239_v49 }
 0x806   :  { %v7176_v53 = vpop.f32.mrb[40].mxu1 }
 0x807   :  { %v7178_v54 = vpop.f32.mrb[41].mxu1 }
 0x808   :  { %v7183_v56 = vpop.f32.mrb[42].mxu1 }
 0x809   :  { %v2374_v57 = vpack.c.bf16 %v7183_v56, %v7176_v53  ;;  %v7187_v58 = vpop.f32.mrb[43].mxu1 }
 0x80a   :  { %v2373_v20 = vpack.c.bf16 %v7187_v58, %v7178_v54 }
 0x80b   :  { %5915 = vmatmul.mubr.msk.bf16.gmra.mrb[148].mxu1 %vm1125_vm2, %v6240_v55 }
 0x80e   :  { %v7192_v59 = vpop.f32.mrb[44].mxu1 }
 0x80f   :  { %v7194_v60 = vpop.f32.mrb[45].mxu1 }
 0x810   :  { %v7196_v61 = vpop.f32.mrb[46].mxu1 }
 0x811   :  { %v2376_v62 = vpack.c.bf16 %v7196_v61, %v7192_v59  ;;  %v7200_v63 = vpop.f32.mrb[47].mxu1 }
 0x812   :  { %v2375_v0 = vpack.c.bf16 %v7200_v63, %v7194_v60 }
 0x816   :  { %v7204_v1 = vpop.f32.mrb[48].mxu1 }
 0x817   :  { %v7206_v2 = vpop.f32.mrb[49].mxu1 }
 0x818   :  { %v7208_v3 = vpop.f32.mrb[50].mxu1 }
 0x819   :  { %v2378_v4 = vpack.c.bf16 %v7208_v3, %v7204_v1  ;;  %v7212_v5 = vpop.f32.mrb[51].mxu1 }
 0x81a   :  { %v2377_v6 = vpack.c.bf16 %v7212_v5, %v7206_v2 }
 0x81e   :  { %v7216_v7 = vpop.f32.mrb[52].mxu1 }
 0x81f   :  { %v7218_v8 = vpop.f32.mrb[53].mxu1 }
 0x820   :  { %v7220_v9 = vpop.f32.mrb[54].mxu1 }
 0x821   :  { %v2380_v10 = vpack.c.bf16 %v7220_v9, %v7216_v7  ;;  %v7224_v11 = vpop.f32.mrb[55].mxu1 }
 0x822   :  { %v2379_v12 = vpack.c.bf16 %v7224_v11, %v7218_v8 }
 0x826   :  { %v5706_v14 = vpop.f32.mrb[56].mxu1 }
 0x827   :  { %v2576_v15 = vpop.f32.mrb[57].mxu1 }
 0x828   :  { %v5707_v16 = vpop.f32.mrb[58].mxu1 }
 0x829   :  { %v2706_v17 = vpack.c.bf16 %v5707_v16, %v5706_v14  ;;  %v2579_v18 = vpop.f32.mrb[59].mxu1 }
 0x82a   :  { %v2705_v19 = vpack.c.bf16 %v2579_v18, %v2576_v15 }
 0x82c   :  { %5738 = vmatprep.mubr.msk.bf16.mxu0 %vm2721_vm5, %v2705_v19 }
 0x82d   :  { %5739 = vmatmul.mubr.msk.bf16.vlgmr.msra.gmra.mrb[44].mxu0 %vm2721_vm5, %v2706_v17 }
 0x82e   :  { %v5710_v31 = vpop.f32.mrb[60].mxu1  ;;  %5771 = vmatpush3.bf16.msra.mxu0 %v2984_v23 }
 0x82f   :  { %v2592_v33 = vpop.f32.mrb[61].mxu1  ;;  %6074 = vmatprep.subr.msk.bf16.mxu0 %vm2770_vm4, %v7234_v25 }
 0x830   :  { %v5711_v39 = vpop.f32.mrb[62].mxu1 }
 0x831   :  { %v2708_v41 = vpack.c.bf16 %v5711_v39, %v5710_v31  ;;  %v2595_v47 = vpop.f32.mrb[63].mxu1 }
 0x832   :  { %v2707_v49 = vpack.c.bf16 %v2595_v47, %v2592_v33 }
 0x834   :  { %5742 = vmatprep.mubr.msk.bf16.mxu0 %vm2721_vm5, %v2707_v49 }
 0x835   :  { %5743 = vmatmul.mubr.msk.bf16.gmra.mrb[48].mxu0 %vm2721_vm5, %v2708_v41 }
 0x836   :  { %v5714_v13 = vpop.f32.mrb[64].mxu1 }
 0x837   :  { %v2608_v55 = vpop.f32.mrb[65].mxu1 }
 0x838   :  { %v5715_v14 = vpop.f32.mrb[66].mxu1 }
 0x839   :  { %v2710_v15 = vpack.c.bf16 %v5715_v14, %v5714_v13  ;;  %v2611_v16 = vpop.f32.mrb[67].mxu1 }
 0x83a   :  { %v2709_v17 = vpack.c.bf16 %v2611_v16, %v2608_v55 }
 0x83c   :  { %5746 = vmatprep.mubr.msk.bf16.mxu0 %vm2721_vm5, %v2709_v17 }
 0x83d   :  { %5747 = vmatmul.mubr.msk.bf16.gmra.mrb[52].mxu0 %vm2721_vm5, %v2710_v15 }
 0x83e   :  { %v5718_v18 = vpop.f32.mrb[68].mxu1 }
 0x83f   :  { %v2624_v19 = vpop.f32.mrb[69].mxu1 }
 0x840   :  { %v5719_v23 = vpop.f32.mrb[70].mxu1 }
 0x841   :  { %v2712_v31 = vpack.c.bf16 %v5719_v23, %v5718_v18  ;;  %v2627_v39 = vpop.f32.mrb[71].mxu1 }
 0x842   :  { %v2711_v33 = vpack.c.bf16 %v2627_v39, %v2624_v19 }
 0x844   :  { %5750 = vmatprep.mubr.msk.bf16.mxu0 %vm2721_vm5, %v2711_v33 }
 0x845   :  { %5751 = vmatmul.mubr.msk.bf16.gmra.mrb[56].mxu0 %vm2721_vm5, %v2712_v31 }
 0x846   :  { %v5722_v41 = vpop.f32.mrb[72].mxu1 }
 0x847   :  { %v2640_v47 = vpop.f32.mrb[73].mxu1 }
 0x848   :  { %v5723_v49 = vpop.f32.mrb[74].mxu1 }
 0x849   :  { %v2714_v13 = vpack.c.bf16 %v5723_v49, %v5722_v41  ;;  %v2643_v14 = vpop.f32.mrb[75].mxu1 }
 0x84a   :  { %v2713_v55 = vpack.c.bf16 %v2643_v14, %v2640_v47 }
 0x84c   :  { %5754 = vmatprep.mubr.msk.bf16.mxu0 %vm2721_vm5, %v2713_v55 }
 0x84d   :  { %5755 = vmatmul.mubr.msk.bf16.gmra.mrb[60].mxu0 %vm2721_vm5, %v2714_v13 }
 0x84e   :  { %v5726_v15 = vpop.f32.mrb[76].mxu1 }
 0x84f   :  { %v2656_v16 = vpop.f32.mrb[77].mxu1 }
 0x850   :  { %v5727_v17 = vpop.f32.mrb[78].mxu1 }
 0x851   :  { %v2716_v18 = vpack.c.bf16 %v5727_v17, %v5726_v15  ;;  %v2659_v23 = vpop.f32.mrb[79].mxu1 }
 0x852   :  { %v2715_v19 = vpack.c.bf16 %v2659_v23, %v2656_v16 }
 0x854   :  { %5758 = vmatprep.mubr.msk.bf16.mxu0 %vm2721_vm5, %v2715_v19 }
 0x855   :  { %5759 = vmatmul.mubr.msk.bf16.gmra.mrb[64].mxu0 %vm2721_vm5, %v2716_v18 }
 0x856   :  { %v5730_v31 = vpop.f32.mrb[80].mxu1 }
 0x857   :  { %v2672_v39 = vpop.f32.mrb[81].mxu1 }
 0x858   :  { %v5731_v33 = vpop.f32.mrb[82].mxu1 }
 0x859   :  { %v2718_v41 = vpack.c.bf16 %v5731_v33, %v5730_v31  ;;  %v2675_v49 = vpop.f32.mrb[83].mxu1 }
 0x85a   :  { %v2717_v47 = vpack.c.bf16 %v2675_v49, %v2672_v39 }
 0x85c   :  { %5762 = vmatprep.mubr.msk.bf16.mxu0 %vm2721_vm5, %v2717_v47 }
 0x85d   :  { %5763 = vmatmul.mubr.msk.bf16.gmra.mrb[68].mxu0 %vm2721_vm5, %v2718_v41  ;;  %v3536_v41 = vsel %vm2770_vm4, %v7234_v25, 0 }
 0x85e   :  { %v5734_v13 = vpop.f32.mrb[84].mxu1 }
 0x85f   :  { %v2688_v14 = vpop.f32.mrb[85].mxu1 }
 0x860   :  { %v5735_v55 = vpop.f32.mrb[86].mxu1 }
 0x861   :  { %v2720_v15 = vpack.c.bf16 %v5735_v55, %v5734_v13  ;;  %v2691_v17 = vpop.f32.mrb[87].mxu1 }
 0x862   :  { %v2719_v16 = vpack.c.bf16 %v2691_v17, %v2688_v14  ;;  %v4120_v14 = vsel %vm2770_vm4, %v7274_v22, 0 }
 0x864   :  { %5766 = vmatprep.mubr.msk.bf16.mxu0 %vm2721_vm5, %v2719_v16 }
 0x865   :  { %5767 = vmatmul.mubr.msk.bf16.gmra.mrb[72].mxu0 %vm2721_vm5, %v2720_v15 }
 0x866   :  { %5772 = vmatprep.mubr.msk.bf16.mxu0 %vm2721_vm5, %v2365_v28  ;;  %v7257_v18 = vpop.f32.mrb[88].mxu1 }
 0x867   :  { %v7259_v23 = vpop.f32.mrb[89].mxu1 }
 0x868   :  { %v7261_v19 = vpop.f32.mrb[90].mxu1 }
 0x869   :  { %v3472_v31 = vpack.c.bf16 %v7261_v19, %v7257_v18  ;;  %v7265_v39 = vpop.f32.mrb[91].mxu1 }
 0x86a   :  { %v3471_v33 = vpack.c.bf16 %v7265_v39, %v7259_v23 }
 0x86d   :  { %5773 = vmatmul.mubr.msk.bf16.vlgmr.msra.gmra.mrb[44].mxu0 %vm2721_vm5, %v2366_v26 }
 0x86e   :  { %5776 = vmatprep.mubr.msk.bf16.mxu0 %vm2721_vm5, %v2367_v36  ;;  %5845 = vmatpush3.bf16.msra.mxu0 %v3536_v41  ;;  %v7284_v27 = vpop.f32.mrb[92].mxu1 }
 0x86f   :  { %v7286_v28 = vpop.f32.mrb[93].mxu1  ;;  %6075 = vmatprep.subr.msk.bf16.mxu0 %vm2770_vm4, %v7274_v22 }
 0x870   :  { %v7290_v25 = vpop.f32.mrb[94].mxu1 }
 0x871   :  { %v3474_v21 = vpack.c.bf16 %v7290_v25, %v7284_v27  ;;  %v3361_v24 = vpop.f32.mrb[95].mxu1 }
 0x872   :  { %v3473_v26 = vpack.c.bf16 %v3361_v24, %v7286_v28 }
 0x875   :  { %5777 = vmatmul.mubr.msk.bf16.gmra.mrb[48].mxu0 %vm2721_vm5, %v2368_v34 }
 0x876   :  { %5780 = vmatprep.mubr.msk.bf16.mxu0 %vm2721_vm5, %v2369_v44  ;;  %v7303_v30 = vpop.f32.mrb[96].mxu1 }
 0x877   :  { %v7305_v35 = vpop.f32.mrb[97].mxu1 }
 0x878   :  { %v7307_v36 = vpop.f32.mrb[98].mxu1 }
 0x879   :  { %v3476_v49 = vpack.c.bf16 %v7307_v36, %v7303_v30  ;;  %v3377_v47 = vpop.f32.mrb[99].mxu1 }
 0x87a   :  { %v3475_v13 = vpack.c.bf16 %v3377_v47, %v7305_v35 }
 0x87d   :  { %5781 = vmatmul.mubr.msk.bf16.gmra.mrb[52].mxu0 %vm2721_vm5, %v2370_v42 }
 0x87e   :  { %5784 = vmatprep.mubr.msk.bf16.mxu0 %vm2721_vm5, %v2371_v52  ;;  %v7320_v29 = vpop.f32.mrb[100].mxu1 }
 0x87f   :  { %v7322_v32 = vpop.f32.mrb[101].mxu1 }
 0x880   :  { %v7324_v34 = vpop.f32.mrb[102].mxu1 }
 0x881   :  { %v3478_v38 = vpack.c.bf16 %v7324_v34, %v7320_v29  ;;  %v3393_v43 = vpop.f32.mrb[103].mxu1 }
 0x882   :  { %v3477_v44 = vpack.c.bf16 %v3393_v43, %v7322_v32 }
 0x885   :  { %5785 = vmatmul.mubr.msk.bf16.gmra.mrb[56].mxu0 %vm2721_vm5, %v2372_v50 }
 0x886   :  { %5788 = vmatprep.mubr.msk.bf16.mxu0 %vm2721_vm5, %v2373_v20  ;;  %v7337_v37 = vpop.f32.mrb[104].mxu1 }
 0x887   :  { %v7339_v40 = vpop.f32.mrb[105].mxu1 }
 0x888   :  { %v7341_v42 = vpop.f32.mrb[106].mxu1 }
 0x889   :  { %v3480_v46 = vpack.c.bf16 %v7341_v42, %v7337_v37  ;;  %v3409_v51 = vpop.f32.mrb[107].mxu1 }
 0x88a   :  { %v3479_v52 = vpack.c.bf16 %v3409_v51, %v7339_v40 }
 0x88d   :  { %5789 = vmatmul.mubr.msk.bf16.gmra.mrb[60].mxu0 %vm2721_vm5, %v2374_v57 }
 0x88e   :  { %5792 = vmatprep.mubr.msk.bf16.mxu0 %vm2721_vm5, %v2375_v0  ;;  %v7354_v45 = vpop.f32.mrb[108].mxu1 }
 0x88f   :  { %v7356_v48 = vpop.f32.mrb[109].mxu1 }
 0x890   :  { %v7358_v50 = vpop.f32.mrb[110].mxu1 }
 0x891   :  { %v3482_v54 = vpack.c.bf16 %v7358_v50, %v7354_v45  ;;  %v3425_v58 = vpop.f32.mrb[111].mxu1 }
 0x892   :  { %v3481_v20 = vpack.c.bf16 %v3425_v58, %v7356_v48  ;;  %v7473_v58 = vpop.permute.xlu1 %4434 }
 0x895   :  { %5793 = vmatmul.mubr.msk.bf16.gmra.mrb[64].mxu0 %vm2721_vm5, %v2376_v62 }
 0x896   :  { %5796 = vmatprep.mubr.msk.bf16.mxu0 %vm2721_vm5, %v2377_v6  ;;  %v7371_v53 = vpop.f32.mrb[112].mxu1 }
 0x897   :  { %v7373_v56 = vpop.f32.mrb[113].mxu1 }
 0x898   :  { %v7375_v57 = vpop.f32.mrb[114].mxu1 }
 0x899   :  { %v3484_v60 = vpack.c.bf16 %v7375_v57, %v7371_v53  ;;  %v3441_v63 = vpop.f32.mrb[115].mxu1  ;;  %v4355_v53 = vpop.permute.xlu1 %4354 }
 0x89a   :  { %v3483_v0 = vpack.c.bf16 %v3441_v63, %v7373_v56  ;;  %v7478_v56 = vld [vmem:[%s7571_s15] sm:$0xff] }
 0x89b   :  { %v5171_v57 = vcombine.high %v7478_v56, %v7478_v56 }
 0x89d   :  { %5797 = vmatmul.mubr.msk.bf16.gmra.mrb[68].mxu0 %vm2721_vm5, %v2378_v4  ;;  %4633 = vmatprep.mubr.bf16.mxu1 %v5171_v57  ;;  %v7484_v63 = vpop.permute.xlu1 %4444 }
 0x89e   :  { %5800 = vmatprep.mubr.msk.bf16.mxu0 %vm2721_vm5, %v2379_v12  ;;  %v7388_v59 = vpop.f32.mrb[116].mxu1 }
 0x89f   :  { %v7390_v61 = vpop.f32.mrb[117].mxu1 }
 0x8a0   :  { %v7392_v62 = vpop.f32.mrb[118].mxu1 }
 0x8a1   :  { %v3486_v2 = vpack.c.bf16 %v7392_v62, %v7388_v59  ;;  %v3457_v5 = vpop.f32.mrb[119].mxu1  ;;  %v4365_v59 = vpop.permute.xlu1 %4364 }
 0x8a2   :  { %v3485_v6 = vpack.c.bf16 %v3457_v5, %v7390_v61 }
 0x8a5   :  { %5801 = vmatmul.mubr.msk.bf16.gmra.mrb[72].mxu0 %vm2721_vm5, %v2380_v10  ;;  %v7488_v62 = vpop.permute.xlu1 %4454 }
 0x8a6   :  { %5846 = vmatprep.mubr.msk.bf16.mxu0 %vm2721_vm5, %v3471_v33  ;;  %v7402_v1 = vpop.f32.mrb[120].mxu1 }
 0x8a7   :  { %v7404_v3 = vpop.f32.mrb[121].mxu1 }
 0x8a8   :  { %v7406_v4 = vpop.f32.mrb[122].mxu1 }
 0x8a9   :  { %v4056_v8 = vpack.c.bf16 %v7406_v4, %v7402_v1  ;;  %v3929_v11 = vpop.f32.mrb[123].mxu1  ;;  %v4375_v5 = vpop.permute.xlu1 %4374 }
 0x8aa   :  { %v4055_v12 = vpack.c.bf16 %v3929_v11, %v7404_v3 }
 0x8ad   :  { %5847 = vmatmul.mubr.msk.bf16.vlgmr.msra.gmra.mrb[44].mxu0 %vm2721_vm5, %v3472_v31  ;;  %v7492_v1 = vpop.permute.xlu1 %4464 }
 0x8ae   :  { %5850 = vmatprep.mubr.msk.bf16.mxu0 %vm2721_vm5, %v3473_v26  ;;  %5919 = vmatpush3.bf16.msra.mxu0 %v4120_v14  ;;  %v5892_v7 = vpop.f32.mrb[124].mxu1 }
 0x8af   :  { %v3942_v9 = vpop.f32.mrb[125].mxu1 }
 0x8b0   :  { %v5893_v10 = vpop.f32.mrb[126].mxu1 }
 0x8b1   :  { %v4058_v55 = vpack.c.bf16 %v5893_v10, %v5892_v7  ;;  %v3945_v15 = vpop.f32.mrb[127].mxu1  ;;  %v4385_v4 = vpop.permute.xlu1 %4384 }
 0x8b2   :  { %v4057_v17 = vpack.c.bf16 %v3945_v15, %v3942_v9 }
 0x8b5   :  { %5851 = vmatmul.mubr.msk.bf16.gmra.mrb[48].mxu0 %vm2721_vm5, %v3474_v21  ;;  %v7496_v11 = vpop.permute.xlu1 %4474 }
 0x8b6   :  { %5854 = vmatprep.mubr.msk.bf16.mxu0 %vm2721_vm5, %v3475_v13  ;;  %v5896_v16 = vpop.f32.mrb[128].mxu1 }
 0x8b7   :  { %v3958_v18 = vpop.f32.mrb[129].mxu1 }
 0x8b8   :  { %v5897_v23 = vpop.f32.mrb[130].mxu1 }
 0x8b9   :  { %v4060_v19 = vpack.c.bf16 %v5897_v23, %v5896_v16  ;;  %v3961_v31 = vpop.f32.mrb[131].mxu1  ;;  %v4395_v14 = vpop.permute.xlu1 %4394 }
 0x8ba   :  { %v4059_v39 = vpack.c.bf16 %v3961_v31, %v3958_v18 }
 0x8bd   :  { %5855 = vmatmul.mubr.msk.bf16.gmra.mrb[52].mxu0 %vm2721_vm5, %v3476_v49  ;;  %v7500_v9 = vpop.permute.xlu1 %4484 }
 0x8be   :  { %5858 = vmatprep.mubr.msk.bf16.mxu0 %vm2721_vm5, %v3477_v44  ;;  %v5900_v33 = vpop.f32.mrb[132].mxu1 }
 0x8bf   :  { %v3974_v41 = vpop.f32.mrb[133].mxu1 }
 0x8c0   :  { %v5901_v22 = vpop.f32.mrb[134].mxu1 }
 0x8c1   :  { %v4062_v27 = vpack.c.bf16 %v5901_v22, %v5900_v33  ;;  %v3977_v28 = vpop.f32.mrb[135].mxu1  ;;  %v4405_v16 = vpop.permute.xlu1 %4404 }
 0x8c2   :  { %v4061_v25 = vpack.c.bf16 %v3977_v28, %v3974_v41 }
 0x8c5   :  { %5859 = vmatmul.mubr.msk.bf16.gmra.mrb[56].mxu0 %vm2721_vm5, %v3478_v38 }
 0x8c6   :  { %5862 = vmatprep.mubr.msk.bf16.mxu0 %vm2721_vm5, %v3479_v52  ;;  %v5904_v21 = vpop.f32.mrb[136].mxu1 }
 0x8c7   :  { %v3990_v24 = vpop.f32.mrb[137].mxu1 }
 0x8c8   :  { %v5905_v26 = vpop.f32.mrb[138].mxu1 }
 0x8c9   :  { %v4064_v30 = vpack.c.bf16 %v5905_v26, %v5904_v21  ;;  %v3993_v35 = vpop.f32.mrb[139].mxu1  ;;  %v7506_v21 = vpop.permute.xlu1 %4494 }
 0x8ca   :  { %v4063_v36 = vpack.c.bf16 %v3993_v35, %v3990_v24 }
 0x8cd   :  { %5863 = vmatmul.mubr.msk.bf16.gmra.mrb[60].mxu0 %vm2721_vm5, %v3480_v46 }
 0x8ce   :  { %5866 = vmatprep.mubr.msk.bf16.mxu0 %vm2721_vm5, %v3481_v20  ;;  %v5908_v49 = vpop.f32.mrb[140].mxu1 }
 0x8cf   :  { %v4006_v47 = vpop.f32.mrb[141].mxu1 }
 0x8d0   :  { %v5909_v13 = vpop.f32.mrb[142].mxu1 }
 0x8d1   :  { %v4066_v29 = vpack.c.bf16 %v5909_v13, %v5908_v49  ;;  %v4009_v32 = vpop.f32.mrb[143].mxu1 }
 0x8d2   :  { %v4065_v34 = vpack.c.bf16 %v4009_v32, %v4006_v47 }
 0x8d5   :  { %5867 = vmatmul.mubr.msk.bf16.gmra.mrb[64].mxu0 %vm2721_vm5, %v3482_v54  ;;  %v7471_v54 = vpop.permute.xlu0 %4429 }
 0x8d6   :  { %5870 = vmatprep.mubr.msk.bf16.mxu0 %vm2721_vm5, %v3483_v0  ;;  %v5912_v38 = vpop.f32.mrb[144].mxu1 }
 0x8d7   :  { %v4022_v43 = vpop.f32.mrb[145].mxu1 }
 0x8d8   :  { %v5913_v44 = vpop.f32.mrb[146].mxu1 }
 0x8d9   :  { %v4068_v37 = vpack.c.bf16 %v5913_v44, %v5912_v38  ;;  %v4025_v40 = vpop.f32.mrb[147].mxu1  ;;  %v4350_v20 = vpop.permute.xlu0 %4349 }
 0x8da   :  { %v4067_v42 = vpack.c.bf16 %v4025_v40, %v4022_v43  ;;  %v4415_v43 = vpop.permute.xlu1 %4414 }
 0x8dd   :  { %5871 = vmatmul.mubr.msk.bf16.gmra.mrb[68].mxu0 %vm2721_vm5, %v3484_v60  ;;  %v7482_v60 = vpop.permute.xlu0 %4439 }
 0x8de   :  { %5874 = vmatprep.mubr.msk.bf16.mxu0 %vm2721_vm5, %v3485_v6  ;;  %v5916_v46 = vpop.f32.mrb[148].mxu1  ;;  %v7516_v57 = vpop.permute.xlu1 %4504 }
 0x8df   :  { %v4038_v51 = vpop.f32.mrb[149].mxu1 }
 0x8e0   :  { %v5917_v52 = vpop.f32.mrb[150].mxu1 }
 0x8e1   :  { %v4070_v45 = vpack.c.bf16 %v5917_v52, %v5916_v46  ;;  %v4041_v48 = vpop.f32.mrb[151].mxu1  ;;  %v4360_v0 = vpop.permute.xlu0 %4359 }
 0x8e2   :  { %v4069_v50 = vpack.c.bf16 %v4041_v48, %v4038_v51 }
 0x8e5   :  { %5875 = vmatmul.mubr.msk.bf16.gmra.mrb[72].mxu0 %vm2721_vm5, %v3486_v2  ;;  %v7486_v61 = vpop.permute.xlu0 %4449 }
 0x8e6   :  { %5920 = vmatprep.mubr.msk.bf16.mxu0 %vm2721_vm5, %v4055_v12 }
 0x8e9   :  { %v4370_v2 = vpop.permute.xlu0 %4369 }
 0x8ed   :  { %5921 = vmatmul.mubr.msk.bf16.vlgmr.msra.gmra.mrb[44].mxu0 %vm2721_vm5, %v4056_v8  ;;  %v7490_v6 = vpop.permute.xlu0 %4459 }
 0x8ee   :  { %5924 = vmatprep.mubr.msk.bf16.mxu0 %vm2721_vm5, %v4057_v17 }
 0x8f1   :  { %v4380_v3 = vpop.permute.xlu0 %4379 }
 0x8f5   :  { %5925 = vmatmul.mubr.msk.bf16.gmra.mrb[48].mxu0 %vm2721_vm5, %v4058_v55  ;;  %v7494_v8 = vpop.permute.xlu0 %4469 }
 0x8f6   :  { %5928 = vmatprep.mubr.msk.bf16.mxu0 %vm2721_vm5, %v4059_v39 }
 0x8f9   :  { %v4390_v12 = vpop.permute.xlu0 %4389 }
 0x8fd   :  { %5929 = vmatmul.mubr.msk.bf16.gmra.mrb[52].mxu0 %vm2721_vm5, %v4060_v19  ;;  %v7498_v7 = vpop.permute.xlu0 %4479 }
 0x8fe   :  { %5932 = vmatprep.mubr.msk.bf16.mxu0 %vm2721_vm5, %v4061_v25 }
 0x901   :  { %v4400_v10 = vpop.permute.xlu0 %4399 }
 0x905   :  { %5933 = vmatmul.mubr.msk.bf16.gmra.mrb[56].mxu0 %vm2721_vm5, %v4062_v27  ;;  %v7502_v22 = vpop.permute.xlu0 %4489 }
 0x906   :  { %5936 = vmatprep.mubr.msk.bf16.mxu0 %vm2721_vm5, %v4063_v36 }
 0x90d   :  { %5937 = vmatmul.mubr.msk.bf16.gmra.mrb[60].mxu0 %vm2721_vm5, %v4064_v30 }
 0x90e   :  { %5940 = vmatprep.mubr.msk.bf16.mxu0 %vm2721_vm5, %v4065_v34 }
 0x915   :  { %5941 = vmatmul.mubr.msk.bf16.gmra.mrb[64].mxu0 %vm2721_vm5, %v4066_v29  ;;  %v4410_v29 = vpop.permute.xlu0 %4409 }
 0x916   :  { %5944 = vmatprep.mubr.msk.bf16.mxu0 %vm2721_vm5, %v4067_v42 }
 0x91d   :  { %5945 = vmatmul.mubr.msk.bf16.gmra.mrb[68].mxu0 %vm2721_vm5, %v4068_v37 }
 0x91e   :  { %5948 = vmatprep.mubr.msk.bf16.mxu0 %vm2721_vm5, %v4069_v50 }
 0x925   :  { %5949 = vmatmul.mubr.msk.bf16.gmra.mrb[72].mxu0 %vm2721_vm5, %v4070_v45  ;;  %v7514_v45 = vpop.permute.xlu0 %4499 }
 0x9c0   :  { %v5922_v55 = vpop.f32.mrb[44].mxu0 }
 0x9c1   :  { %v4509_v15 = vadd.f32 %v5922_v55, %v4360_v0  ;;  %v4156_v17 = vpop.f32.mrb[45].mxu0  ;;  %v4420_v55 = vpop.permute.xlu0 %4419 }
 0x9c2   :  { %v4507_v18 = vadd.f32 %v4350_v20, %v4156_v17  ;;  %v5923_v23 = vpop.f32.mrb[46].mxu0 }
 0x9c3   :  { %v4510_v19 = vadd.f32 %v5923_v23, %v4365_v59  ;;  %v4159_v31 = vpop.f32.mrb[47].mxu0  ;;  %v4541_v33 = vmax.f32 %v4509_v15, 0.0  ;;  %v4425_v23 = vpop.permute.xlu1 %4424 }
 0x9c4   :  { %v4508_v39 = vadd.f32 %v4355_v53, %v4159_v31  ;;  %v4539_v27 = vmax.f32 %v4507_v18, 0.0 }
 0x9c5   :  { %v4542_v41 = vmax.f32 %v4510_v19, 0.0 }
 0x9c6   :  { %v4540_v28 = vmax.f32 %v4508_v39, 0.0 }
 0x9c7   :  { %v7504_v25 = vpack.c.bf16 %v4542_v41, %v4541_v33 }
 0x9c8   :  { %v7508_v24 = vpack.c.bf16 %v4540_v28, %v4539_v27  ;;  %v5926_v26 = vpop.f32.mrb[48].mxu0 }
 0x9c9   :  { %v4513_v30 = vadd.f32 %v5926_v26, %v4380_v3  ;;  %v4172_v35 = vpop.f32.mrb[49].mxu0 }
 0x9ca   :  { %v4511_v36 = vadd.f32 %v4370_v2, %v4172_v35  ;;  %v5927_v49 = vpop.f32.mrb[50].mxu0 }
 0x9cb   :  { %v4514_v47 = vadd.f32 %v5927_v49, %v4385_v4  ;;  %v4175_v13 = vpop.f32.mrb[51].mxu0  ;;  %v4545_v34 = vmax.f32 %v4513_v30, 0.0 }
 0x9cc   :  { %v4512_v32 = vadd.f32 %v4375_v5, %v4175_v13  ;;  %v4543_v44 = vmax.f32 %v4511_v36, 0.0 }
 0x9cd   :  { %v4546_v38 = vmax.f32 %v4514_v47, 0.0 }
 0x9ce   :  { %v4544_v37 = vmax.f32 %v4512_v32, 0.0 }
 0x9cf   :  { %v7510_v40 = vpack.c.bf16 %v4546_v38, %v4545_v34 }
 0x9d0   :  { %v7512_v42 = vpack.c.bf16 %v4544_v37, %v4543_v44  ;;  %v5930_v46 = vpop.f32.mrb[52].mxu0 }
 0x9d1   :  { %v4517_v51 = vadd.f32 %v5930_v46, %v4400_v10  ;;  %v4188_v52 = vpop.f32.mrb[53].mxu0 }
 0x9d2   :  { %v4515_v48 = vadd.f32 %v4390_v12, %v4188_v52  ;;  %v5931_v50 = vpop.f32.mrb[54].mxu0 }
 0x9d3   :  { %v4518_v20 = vadd.f32 %v5931_v50, %v4405_v16  ;;  %v4191_v53 = vpop.f32.mrb[55].mxu0  ;;  %v4549_v59 = vmax.f32 %v4517_v51, 0.0 }
 0x9d4   :  { %v4516_v0 = vadd.f32 %v4395_v14, %v4191_v53  ;;  %v4547_v5 = vmax.f32 %v4515_v48, 0.0 }
 0x9d5   :  { %v4550_v2 = vmax.f32 %v4518_v20, 0.0 }
 0x9d6   :  { %v4548_v3 = vmax.f32 %v4516_v0, 0.0 }
 0x9d7   :  { %v7518_v4 = vpack.c.bf16 %v4550_v2, %v4549_v59 }
 0x9d8   :  { %v7520_v15 = vpack.c.bf16 %v4548_v3, %v4547_v5  ;;  %v5934_v10 = vpop.f32.mrb[56].mxu0 }
 0x9d9   :  { %v4521_v17 = vadd.f32 %v5934_v10, %v4420_v55  ;;  %v4204_v18 = vpop.f32.mrb[57].mxu0 }
 0x9da   :  { %v4519_v12 = vadd.f32 %v4410_v29, %v4204_v18  ;;  %v5935_v19 = vpop.f32.mrb[58].mxu0 }
 0x9db   :  { %v4522_v16 = vadd.f32 %v5935_v19, %v4425_v23  ;;  %v4207_v31 = vpop.f32.mrb[59].mxu0  ;;  %v4553_v33 = vmax.f32 %v4521_v17, 0.0 }
 0x9dc   :  { %v4520_v39 = vadd.f32 %v4415_v43, %v4207_v31  ;;  %v4551_v41 = vmax.f32 %v4519_v12, 0.0 }
 0x9dd   :  { %v4554_v14 = vmax.f32 %v4522_v16, 0.0 }
 0x9de   :  { %v4552_v27 = vmax.f32 %v4520_v39, 0.0 }
 0x9df   :  { %v7522_v28 = vpack.c.bf16 %v4554_v14, %v4553_v33 }
 0x9e0   :  { %v7524_v26 = vpack.c.bf16 %v4552_v27, %v4551_v41  ;;  %v5938_v30 = vpop.f32.mrb[60].mxu0 }
 0x9e1   :  { %v4525_v35 = vadd.f32 %v5938_v30, %v7482_v60  ;;  %v4220_v36 = vpop.f32.mrb[61].mxu0 }
 0x9e2   :  { %v4523_v49 = vadd.f32 %v7471_v54, %v4220_v36  ;;  %v5939_v47 = vpop.f32.mrb[62].mxu0 }
 0x9e3   :  { %v4526_v13 = vadd.f32 %v5939_v47, %v7484_v63  ;;  %v4223_v29 = vpop.f32.mrb[63].mxu0  ;;  %v4557_v34 = vmax.f32 %v4525_v35, 0.0  ;;  %v4592_v35 = vpop.permute.xlu0 %4591 }
 0x9e4   :  { %v4524_v32 = vadd.f32 %v7473_v58, %v4223_v29  ;;  %v4555_v43 = vmax.f32 %v4523_v49, 0.0 }
 0x9e5   :  { %v4558_v38 = vmax.f32 %v4526_v13, 0.0 }
 0x9e6   :  { %v4556_v44 = vmax.f32 %v4524_v32, 0.0 }
 0x9e7   :  { %v4581_v37 = vpack.c.bf16 %v4558_v38, %v4557_v34 }
 0x9e8   :  { %v4580_v46 = vpack.c.bf16 %v4556_v44, %v4555_v43  ;;  %v5942_v51 = vpop.f32.mrb[64].mxu0 }
 0x9e9   :  { %v4529_v52 = vadd.f32 %v5942_v51, %v7490_v6  ;;  %v4236_v48 = vpop.f32.mrb[65].mxu0 }
 0x9ea   :  { %v4527_v60 = vadd.f32 %v7486_v61, %v4236_v48  ;;  %v5943_v50 = vpop.f32.mrb[66].mxu0  ;;  %5452 = vmatprep.subr.bf16.mxu1 %v4580_v46 }
 0x9eb   :  { %v4530_v54 = vadd.f32 %v5943_v50, %v7492_v1  ;;  %v4239_v63 = vpop.f32.mrb[67].mxu0  ;;  %5453 = vmatpush3.bf16.msra.mxu1 %v7508_v24  ;;  %v4561_v20 = vmax.f32 %v4529_v52, 0.0 }
 0x9ec   :  { %v4528_v58 = vadd.f32 %v7488_v62, %v4239_v63  ;;  %5454 = vmatprep.subr.bf16.mxu1 %v4581_v37  ;;  %v4559_v0 = vmax.f32 %v4527_v60, 0.0 }
 0x9ed   :  { %v4562_v53 = vmax.f32 %v4530_v54, 0.0 }
 0x9ee   :  { %v4560_v59 = vmax.f32 %v4528_v58, 0.0 }
 0x9ef   :  { %v4583_v2 = vpack.c.bf16 %v4562_v53, %v4561_v20  ;;  %5455 = vmatpush3.bf16.msra.mxu1 %v7504_v25 }
 0x9f0   :  { %v4582_v6 = vpack.c.bf16 %v4560_v59, %v4559_v0  ;;  %v5946_v5 = vpop.f32.mrb[68].mxu0 }
 0x9f1   :  { %v4533_v61 = vadd.f32 %v5946_v5, %v7498_v7  ;;  %v4252_v3 = vpop.f32.mrb[69].mxu0 }
 0x9f2   :  { %v4531_v1 = vadd.f32 %v7494_v8, %v4252_v3  ;;  %v5947_v55 = vpop.f32.mrb[70].mxu0  ;;  %5456 = vmatprep.subr.bf16.mxu1 %v4582_v6 }
 0x9f3   :  { %v4534_v24 = vadd.f32 %v5947_v55, %v7500_v9  ;;  %v4255_v62 = vpop.f32.mrb[71].mxu0  ;;  %5457 = vmatpush3.bf16.msra.mxu1 %v7512_v42  ;;  %v4565_v17 = vmax.f32 %v4533_v61, 0.0 }
 0x9f4   :  { %v4532_v10 = vadd.f32 %v7496_v11, %v4255_v62  ;;  %5458 = vmatprep.subr.bf16.mxu1 %v4583_v2  ;;  %v4563_v25 = vmax.f32 %v4531_v1, 0.0 }
 0x9f5   :  { %v4566_v18 = vmax.f32 %v4534_v24, 0.0 }
 0x9f6   :  { %v4564_v23 = vmax.f32 %v4532_v10, 0.0 }
 0x9f7   :  { %v4585_v12 = vpack.c.bf16 %v4566_v18, %v4565_v17  ;;  %5459 = vmatpush3.bf16.msra.mxu1 %v7510_v40 }
 0x9f8   :  { %v4584_v7 = vpack.c.bf16 %v4564_v23, %v4563_v25  ;;  %v5950_v19 = vpop.f32.mrb[72].mxu0 }
 0x9f9   :  { %v4537_v8 = vadd.f32 %v5950_v19, %v7514_v45  ;;  %v4268_v16 = vpop.f32.mrb[73].mxu0 }
 0x9fa   :  { %v4535_v9 = vadd.f32 %v7502_v22, %v4268_v16  ;;  %v5951_v31 = vpop.f32.mrb[74].mxu0  ;;  %5460 = vmatprep.subr.bf16.mxu1 %v4584_v7  ;;  %v5170_v22 = vcombine.low %v7478_v56, %v7478_v56 }
 0x9fb   :  { %v4538_v42 = vadd.f32 %v5951_v31, %v7516_v57  ;;  %v4271_v11 = vpop.f32.mrb[75].mxu0  ;;  %5461 = vmatpush3.bf16.msra.mxu1 %v7520_v15  ;;  %v4569_v33 = vmax.f32 %v4537_v8, 0.0 }
 0x9fc   :  { %v4536_v39 = vadd.f32 %v7506_v21, %v4271_v11  ;;  %5462 = vmatprep.subr.bf16.mxu1 %v4585_v12  ;;  %v4567_v40 = vmax.f32 %v4535_v9, 0.0 }
 0x9fd   :  { %v4570_v14 = vmax.f32 %v4538_v42, 0.0 }
 0x9fe   :  { %v4568_v41 = vmax.f32 %v4536_v39, 0.0 }
 0x9ff   :  { %v4587_v27 = vpack.c.bf16 %v4570_v14, %v4569_v33  ;;  %5463 = vmatpush3.bf16.msra.mxu1 %v7518_v4 }
 0xa00   :  { %v4586_v45 = vpack.c.bf16 %v4568_v41, %v4567_v40 }
 0xa02   :  { %5464 = vmatprep.subr.bf16.mxu1 %v4586_v45 }
 0xa03   :  { %5465 = vmatpush3.bf16.msra.mxu1 %v7524_v26 }
 0xa04   :  { %5466 = vmatprep.subr.bf16.mxu1 %v4587_v27 }
 0xa07   :  { %5467 = vmatpush3.bf16.msra.mxu1 %v7522_v28 }
 0xa0a   :  { %4634 = vmatmul.mubr.bf16.vlgmr.msra.gmra.mrb[152].mxu1 %v5170_v22 }
 0xadd   :  { %v5468_v21 = vpop.f32.mrb[152].mxu1 }
 0xade   :  { %v5469_v57 = vpop.f32.mrb[153].mxu1 }
 0xadf   :  { %v5470_v15 = vadd.f32 %v5469_v57, %v5468_v21  ;;  %v5471_v30 = vpop.f32.mrb[154].mxu1 }
 0xae0   :  { %v5472_v36 = vpop.f32.mrb[155].mxu1 }
 0xae1   :  { %v4636_v49 = vadd.f32 %v5470_v15, %v4592_v35 }
 0xae3   :  { %4642 = vst.msk [vmem:[%s7572_s17] sm:$0xff] %vm4641_vm6, %v4636_v49 }

</bundles_post_ra>
